<compile_context>
chip_gen: v7x
topology: tpu7x:2x2x1
jax: 0.10.0
libtpu: 0.0.40
codegen_flags: <defaults>
</compile_context>

<pallas_src>
import jax
import jax.numpy as jnp
from jax.experimental import pallas as pl
from jax.experimental.pallas import tpu as pltpu

# ----- model config (small, consistent with the module) -----
B = 2          # batch
N = 8          # sequence length (tokens)
D = 32         # model dim
H = 4          # head_num
HD = D // H    # head_dim
F = 2048       # hidden dim of linear_1 (fixed to 2048 in the module)
BN = B * N     # rows after folding batch into the matmul M dimension
EPS = 1e-5     # nn.LayerNorm default eps


def _layernorm(v, gamma, beta):
    mu = jnp.mean(v, axis=-1, keepdims=True)
    var = jnp.mean((v - mu) ** 2, axis=-1, keepdims=True)
    return (v - mu) * jax.lax.rsqrt(var + EPS) * gamma + beta


def transformer_block_kernel(
    x_ref,                       # (BN, D)   f32  VMEM
    ln1_g, ln1_b,                # (1, D)    f32
    wqkv, bqkv,                  # (D, 3D), (1, 3D) f32  (fused Q|K|V)
    wo, bo,                      # (D, D), (1, D)  f32
    ln2_g, ln2_b,                # (1, D)    f32
    w1_hbm,                      # (D, F)  bf16   HBM (pl.ANY)
    b1,                          # (1, F)  f32    VMEM
    w2t_hbm,                     # (D, F)  bf16   HBM (pl.ANY) -- W2^T, lane-dense
    b2,                          # (1, D)  f32
    o_ref,                       # (BN, D) f32
    w1_vmem, w2t_vmem,           # (D, F) bf16 scratch landing buffers
    dma_sems,                    # DMA semaphores (2,)
):
    # ---- start the MLP weight DMAs first so the ~256 KiB HBM transfer
    # overlaps with LN1 + QKV + attention (manual double-buffer-style overlap).
    cp_w1 = pltpu.make_async_copy(w1_hbm, w1_vmem, dma_sems.at[0])
    cp_w2 = pltpu.make_async_copy(w2t_hbm, w2t_vmem, dma_sems.at[1])
    cp_w1.start()
    cp_w2.start()

    x = x_ref[...]                                         # (BN, D)

    # ---- norm_1 + fused QKV projection (one MXU pass for Q|K|V) ----
    xn = _layernorm(x, ln1_g[...], ln1_b[...])
    qkv = jnp.dot(xn, wqkv[...],
                  preferred_element_type=jnp.float32) + bqkv[...]   # (BN, 3D)

    # PyTorch module scales by sqrt(dim), NOT sqrt(head_dim) -- preserved.
    scale = 1.0 / jnp.sqrt(jnp.float32(D))
    wo_f = wo[...]                                         # (D, D), read once

    # ---- multi-head attention (heads unrolled; B batched in the einsums) ----
    # TODO(synk): full (B,H)-batched attention needs a lane->batch head
    # relayout that Mosaic can't reliably lower at these tiny shapes.
    attn = None
    for h in range(H):                                     # H = 4, unrolled
        lo = h * HD
        qs = qkv[:, lo:lo + HD].reshape(B, N, HD)                  # (B, N, HD)
        ks = qkv[:, D + lo:D + lo + HD].reshape(B, N, HD)
        vs = qkv[:, 2 * D + lo:2 * D + lo + HD].reshape(B, N, HD)

        s = jnp.einsum('bnd,bmd->bnm', qs, ks,
                       preferred_element_type=jnp.float32) * scale  # (B, N, N)
        s = s - jnp.max(s, axis=-1, keepdims=True)
        p = jnp.exp(s)
        a = p * pl.reciprocal(jnp.sum(p, axis=-1, keepdims=True), approx=True)
        oh = jnp.einsum('bnm,bmd->bnd', a, vs,
                        preferred_element_type=jnp.float32)          # (B, N, HD)
        contrib = jnp.dot(oh.reshape(BN, HD), wo_f[lo:lo + HD, :],
                          preferred_element_type=jnp.float32)        # (BN, D)
        attn = contrib if attn is None else attn + contrib
    attn = attn + bo[...]

    # dropout_1 is identity in eval mode
    r1 = x + attn                                          # residual 1

    # ---- norm_2 ----
    xn2 = _layernorm(r1, ln2_g[...], ln2_b[...])

    # ---- MLP weights should have landed by now (overlapped DMA); wait. ----
    cp_w1.wait()
    cp_w2.wait()

    # ---- SiLU feed-forward: bf16 operands into the MXU, f32 accumulate;
    #      LN / sigmoid / elementwise math stays f32 on the VPU/EUP. ----
    h1 = jnp.dot(xn2.astype(jnp.bfloat16), w1_vmem[...],
                 preferred_element_type=jnp.float32) + b1[...]       # (BN, F)
    h1 = h1 * jax.nn.sigmoid(h1)                           # silu; dropout_2 id
    # w2t is (D, F): contract the F (last) dims of both operands (trans-B).
    h2 = jax.lax.dot_general(h1.astype(jnp.bfloat16), w2t_vmem[...],
                             (((1,), (1,)), ((), ())),
                             preferred_element_type=jnp.float32) + b2[...]

    # dropout_3 identity
    o_ref[...] = r1 + h2


def prepare_params(params):
    """One-time parameter prep (hoisted out of the per-call forward):
    fuse Q/K/V, quantize MLP weights to bf16, pre-transpose W2 lane-dense."""
    (ln1_g, ln1_b, wq, bq, wk, bk, wv, bv, wo, bo,
     ln2_g, ln2_b, w1, b1, w2, b2) = params
    wqkv = jnp.concatenate([wq, wk, wv], axis=1)            # (D, 3D)
    bqkv = jnp.concatenate([bq, bk, bv], axis=1)            # (1, 3D)
    w1_bf = w1.astype(jnp.bfloat16)                         # (D, F)
    w2t_bf = jnp.transpose(w2).astype(jnp.bfloat16)         # (D, F) lane-dense
    return (ln1_g, ln1_b, wqkv, bqkv, wo, bo, ln2_g, ln2_b,
            w1_bf, b1, w2t_bf, b2)


def _cost_estimate():
    flops = (2 * BN * D * (3 * D)                 # fused QKV
             + B * H * 2 * (2 * N * N * HD)       # scores + a@v
             + 2 * BN * D * D                     # output projection
             + 2 * (2 * BN * D * F))              # MLP (both linears)
    transcendentals = B * H * N * N + BN * F + 2 * BN
    bytes_accessed = (2 * BN * D * 4                       # x in + out
                      + (D * 3 * D + D * D) * 4            # wqkv + wo
                      + 2 * D * F * 2                      # w1 + w2^T (bf16)
                      + (3 * D + D + F + D + 4 * D) * 4)   # biases + LN params
    return pl.CostEstimate(flops=flops, transcendentals=transcendentals,
                           bytes_accessed=bytes_accessed)


_VMEM_SPEC = pl.BlockSpec(memory_space=pltpu.MemorySpace.VMEM)
_HBM_SPEC = pl.BlockSpec(memory_space=pl.ANY)


@jax.jit
def transformer_block(x, prepped):
    (ln1_g, ln1_b, wqkv, bqkv, wo, bo, ln2_g, ln2_b,
     w1_bf, b1, w2t_bf, b2) = prepped
    x2d = x.reshape(BN, D)

    out2d = pl.pallas_call(
        transformer_block_kernel,
        out_shape=jax.ShapeDtypeStruct((BN, D), jnp.float32),
        in_specs=[_VMEM_SPEC] * 9 + [_HBM_SPEC, _VMEM_SPEC,
                                     _HBM_SPEC, _VMEM_SPEC],
        out_specs=_VMEM_SPEC,
        scratch_shapes=[
            pltpu.VMEM((D, F), jnp.bfloat16),    # w1 landing buffer
            pltpu.VMEM((D, F), jnp.bfloat16),    # w2^T landing buffer
            pltpu.SemaphoreType.DMA((2,)),
        ],
        cost_estimate=_cost_estimate(),
    )(x2d, ln1_g, ln1_b, wqkv, bqkv, wo, bo, ln2_g, ln2_b,
      w1_bf, b1, w2t_bf, b2)
    return out2d.reshape(B, N, D)


def _xavier_uniform(key, shape):
    fan_in, fan_out = shape
    limit = jnp.sqrt(6.0 / (fan_in + fan_out))
    return jax.random.uniform(key, shape, jnp.float32, -limit, limit)


def init_params(key):
    keys = jax.random.split(key, 12)
    # weights stored as (in, out); xavier for q/k/v (as in module)
    wq = _xavier_uniform(keys[0], (D, D))
    wk = _xavier_uniform(keys[1], (D, D))
    wv = _xavier_uniform(keys[2], (D, D))
    wo = jax.random.normal(keys[3], (D, D), jnp.float32) * 0.02
    w1 = jax.random.normal(keys[4], (D, F), jnp.float32) * 0.02
    w2 = jax.random.normal(keys[5], (F, D), jnp.float32) * 0.02
    bq = jax.random.normal(keys[6], (1, D), jnp.float32) * 0.01
    bk = jax.random.normal(keys[7], (1, D), jnp.float32) * 0.01
    bv = jax.random.normal(keys[8], (1, D), jnp.float32) * 0.01
    bo = jax.random.normal(keys[9], (1, D), jnp.float32) * 0.01
    b1 = jax.random.normal(keys[10], (1, F), jnp.float32) * 0.01
    b2 = jax.random.normal(keys[11], (1, D), jnp.float32) * 0.01
    ln1_g = jnp.ones((1, D), jnp.float32)
    ln1_b = jnp.zeros((1, D), jnp.float32)
    ln2_g = jnp.ones((1, D), jnp.float32)
    ln2_b = jnp.zeros((1, D), jnp.float32)
    return (ln1_g, ln1_b, wq, bq, wk, bk, wv, bv, wo, bo,
            ln2_g, ln2_b, w1, b1, w2, b2)


def reference(x, params):
    """Pure-JAX reference of the PyTorch forward (eval mode).

    Mirrors the kernel's quantization choices (bf16 MLP weights and bf16
    activations into the MLP matmuls, f32 accumulation) so the comparison
    isolates kernel mechanics rather than quantization error.
    """
    (ln1_g, ln1_b, wq, bq, wk, bk, wv, bv, wo, bo,
     ln2_g, ln2_b, w1, b1, w2, b2) = params
    w1q = w1.astype(jnp.bfloat16)
    w2q = w2.astype(jnp.bfloat16)

    def ln(v, g, b):
        mu = v.mean(-1, keepdims=True)
        var = ((v - mu) ** 2).mean(-1, keepdims=True)
        return (v - mu) * jax.lax.rsqrt(var + EPS) * g[0] + b[0]

    xn = ln(x, ln1_g, ln1_b)
    q = xn @ wq + bq[0]
    k = xn @ wk + bk[0]
    v = xn @ wv + bv[0]

    def split(t):   # b n (h d) -> b h n d
        return t.reshape(B, N, H, HD).transpose(0, 2, 1, 3)

    qh, kh, vh = split(q), split(k), split(v)
    s = jnp.einsum("bhnd,bhmd->bhnm", qh, kh) / jnp.sqrt(jnp.float32(D))
    a = jax.nn.softmax(s, axis=-1)
    o = jnp.einsum("bhnm,bhmd->bhnd", a, vh).transpose(0, 2, 1, 3).reshape(B, N, D)
    o = o @ wo + bo[0]
    r1 = x + o
    xn2 = ln(r1, ln2_g, ln2_b)
    h1 = jnp.dot(xn2.astype(jnp.bfloat16).reshape(BN, D), w1q,
                 preferred_element_type=jnp.float32).reshape(B, N, F) + b1[0]
    h1 = h1 * jax.nn.sigmoid(h1)
    h2 = jnp.dot(h1.astype(jnp.bfloat16).reshape(BN, F), w2q,
                 preferred_element_type=jnp.float32).reshape(B, N, D) + b2[0]
    return r1 + h2


if __name__ == "__main__":
    key = jax.random.PRNGKey(0)
    kx, kp = jax.random.split(key)
    x = jax.random.normal(kx, (B, N, D), jnp.float32)
    params = init_params(kp)

    # One-time parameter prep (outside the per-call forward path).
    prepped = jax.block_until_ready(prepare_params(params))

    out = jax.block_until_ready(transformer_block(x, prepped))
    ref = reference(x, params)

    assert out.shape == (B, N, D)
    max_diff = jnp.max(jnp.abs(out - ref))
    assert jnp.allclose(out, ref, atol=1e-2, rtol=1e-2), \
        f"max diff {max_diff}"
    print("KERNEL_OK")
</pallas_src>

<mosaic_0001>
module attributes {stable_mosaic.version = 11 : i64} {
  func.func @transformer_block_kernel(%arg0: memref<16x32xf32, #tpu.memory_space<vmem>>, %arg1: memref<1x32xf32, #tpu.memory_space<vmem>>, %arg2: memref<1x32xf32, #tpu.memory_space<vmem>>, %arg3: memref<32x96xf32, #tpu.memory_space<vmem>>, %arg4: memref<1x96xf32, #tpu.memory_space<vmem>>, %arg5: memref<32x32xf32, #tpu.memory_space<vmem>>, %arg6: memref<1x32xf32, #tpu.memory_space<vmem>>, %arg7: memref<1x32xf32, #tpu.memory_space<vmem>>, %arg8: memref<1x32xf32, #tpu.memory_space<vmem>>, %arg9: memref<32x2048xbf16, #tpu.memory_space<any>>, %arg10: memref<1x2048xf32, #tpu.memory_space<vmem>>, %arg11: memref<32x2048xbf16, #tpu.memory_space<any>>, %arg12: memref<1x32xf32, #tpu.memory_space<vmem>>, %arg13: memref<16x32xf32, #tpu.memory_space<vmem>>, %arg14: memref<32x2048xbf16, #tpu.memory_space<vmem>>, %arg15: memref<32x2048xbf16, #tpu.memory_space<vmem>>, %arg16: memref<2x!tpu.dma_semaphore, #tpu.memory_space<semaphore_mem>>) attributes {dimension_semantics = [], scalar_prefetch = 0 : i64, scratch_operands = 3 : i64, tpu.core_type = #tpu.core_type<tc>} {
    %c0_i32 = arith.constant 0 : i32
    %0 = tpu.memref_slice %arg16[%c0_i32] : memref<2x!tpu.dma_semaphore, #tpu.memory_space<semaphore_mem>> -> memref<1x!tpu.dma_semaphore, #tpu.memory_space<semaphore_mem>>
    %1 = tpu.memref_squeeze %0 : memref<1x!tpu.dma_semaphore, #tpu.memory_space<semaphore_mem>> -> memref<!tpu.dma_semaphore, #tpu.memory_space<semaphore_mem>>
    tpu.enqueue_dma source(%arg9 : memref<32x2048xbf16, #tpu.memory_space<any>>) target(%arg14 : memref<32x2048xbf16, #tpu.memory_space<vmem>>) target_semaphore(%1 : memref<!tpu.dma_semaphore, #tpu.memory_space<semaphore_mem>>)
    %c1_i32 = arith.constant 1 : i32
    %2 = tpu.memref_slice %arg16[%c1_i32] : memref<2x!tpu.dma_semaphore, #tpu.memory_space<semaphore_mem>> -> memref<1x!tpu.dma_semaphore, #tpu.memory_space<semaphore_mem>>
    %3 = tpu.memref_squeeze %2 : memref<1x!tpu.dma_semaphore, #tpu.memory_space<semaphore_mem>> -> memref<!tpu.dma_semaphore, #tpu.memory_space<semaphore_mem>>
    tpu.enqueue_dma source(%arg11 : memref<32x2048xbf16, #tpu.memory_space<any>>) target(%arg15 : memref<32x2048xbf16, #tpu.memory_space<vmem>>) target_semaphore(%3 : memref<!tpu.dma_semaphore, #tpu.memory_space<semaphore_mem>>)
    %c0 = arith.constant 0 : index
    %c0_0 = arith.constant 0 : index
    %4 = vector.load %arg0[%c0, %c0_0] : memref<16x32xf32, #tpu.memory_space<vmem>>, vector<16x32xf32>
    %c0_1 = arith.constant 0 : index
    %c0_2 = arith.constant 0 : index
    %5 = vector.load %arg1[%c0_1, %c0_2] : memref<1x32xf32, #tpu.memory_space<vmem>>, vector<1x32xf32>
    %c0_3 = arith.constant 0 : index
    %c0_4 = arith.constant 0 : index
    %6 = vector.load %arg2[%c0_3, %c0_4] : memref<1x32xf32, #tpu.memory_space<vmem>>, vector<1x32xf32>
    %cst = arith.constant dense<0.000000e+00> : vector<16xf32>
    %7 = vector.multi_reduction <add>, %4, %cst [1] : vector<16x32xf32> to vector<16xf32>
    %8 = vector.shape_cast %7 : vector<16xf32> to vector<16x1xf32>
    %cst_5 = arith.constant 3.200000e+01 : f32
    %9 = vector.broadcast %cst_5 : f32 to vector<16x1xf32>
    %10 = arith.divf %8, %9 : vector<16x1xf32>
    %11 = vector.broadcast %10 : vector<16x1xf32> to vector<16x32xf32>
    %12 = arith.subf %4, %11 : vector<16x32xf32>
    %13 = arith.mulf %12, %12 : vector<16x32xf32>
    %cst_6 = arith.constant dense<0.000000e+00> : vector<16xf32>
    %14 = vector.multi_reduction <add>, %13, %cst_6 [1] : vector<16x32xf32> to vector<16xf32>
    %15 = vector.shape_cast %14 : vector<16xf32> to vector<16x1xf32>
    %cst_7 = arith.constant 3.200000e+01 : f32
    %16 = vector.broadcast %cst_7 : f32 to vector<16x1xf32>
    %17 = arith.divf %15, %16 : vector<16x1xf32>
    %18 = vector.broadcast %10 : vector<16x1xf32> to vector<16x32xf32>
    %19 = arith.subf %4, %18 : vector<16x32xf32>
    %cst_8 = arith.constant 9.99999974E-6 : f32
    %20 = vector.broadcast %cst_8 : f32 to vector<16x1xf32>
    %21 = arith.addf %17, %20 : vector<16x1xf32>
    %22 = math.rsqrt %21 : vector<16x1xf32>
    %23 = vector.broadcast %22 : vector<16x1xf32> to vector<16x32xf32>
    %24 = arith.mulf %19, %23 : vector<16x32xf32>
    %25 = vector.broadcast %5 : vector<1x32xf32> to vector<16x32xf32>
    %26 = arith.mulf %24, %25 : vector<16x32xf32>
    %27 = vector.broadcast %6 : vector<1x32xf32> to vector<16x32xf32>
    %28 = arith.addf %26, %27 : vector<16x32xf32>
    %c0_9 = arith.constant 0 : index
    %c0_10 = arith.constant 0 : index
    %29 = vector.load %arg3[%c0_9, %c0_10] : memref<32x96xf32, #tpu.memory_space<vmem>>, vector<32x96xf32>
    %cst_11 = arith.constant dense<0.000000e+00> : vector<16x96xf32>
    %30 = tpu.matmul %28, %29, %cst_11 {dimension_numbers = #tpu.dot_dimension_numbers<[1], [0], [0], [1], [0, 0, 1, 1], [], []>} : vector<16x32xf32>, vector<32x96xf32>, vector<16x96xf32> -> vector<16x96xf32>
    %c0_12 = arith.constant 0 : index
    %c0_13 = arith.constant 0 : index
    %31 = vector.load %arg4[%c0_12, %c0_13] : memref<1x96xf32, #tpu.memory_space<vmem>>, vector<1x96xf32>
    %32 = vector.broadcast %31 : vector<1x96xf32> to vector<16x96xf32>
    %33 = arith.addf %30, %32 : vector<16x96xf32>
    %cst_14 = arith.constant 3.200000e+01 : f32
    %34 = math.sqrt %cst_14 : f32
    %cst_15 = arith.constant 1.000000e+00 : f32
    %35 = arith.divf %cst_15, %34 : f32
    %c0_16 = arith.constant 0 : index
    %c0_17 = arith.constant 0 : index
    %36 = vector.load %arg5[%c0_16, %c0_17] : memref<32x32xf32, #tpu.memory_space<vmem>>, vector<32x32xf32>
    %37 = vector.extract_strided_slice %33 {offsets = [0, 0], sizes = [16, 8], strides = [1, 1]} : vector<16x96xf32> to vector<16x8xf32>
    %38 = vector.shape_cast %37 : vector<16x8xf32> to vector<2x8x8xf32>
    %39 = vector.extract_strided_slice %33 {offsets = [0, 32], sizes = [16, 8], strides = [1, 1]} : vector<16x96xf32> to vector<16x8xf32>
    %40 = vector.shape_cast %39 : vector<16x8xf32> to vector<2x8x8xf32>
    %41 = vector.extract_strided_slice %33 {offsets = [0, 64], sizes = [16, 8], strides = [1, 1]} : vector<16x96xf32> to vector<16x8xf32>
    %42 = vector.shape_cast %41 : vector<16x8xf32> to vector<2x8x8xf32>
    "tpu.trace_start"() <{level = 10 : i32, message = "bnd,bmd->bnm"}> : () -> ()
    %cst_18 = arith.constant dense<0.000000e+00> : vector<2x8x8xf32>
    %43 = tpu.matmul %38, %40, %cst_18 {dimension_numbers = #tpu.dot_dimension_numbers<[2], [2], [1], [1], [0, 0, 0, 1, 1, 1], [0], [0]>} : vector<2x8x8xf32>, vector<2x8x8xf32>, vector<2x8x8xf32> -> vector<2x8x8xf32>
    "tpu.trace_stop"() : () -> ()
    %44 = vector.broadcast %35 : f32 to vector<2x8x8xf32>
    %45 = arith.mulf %43, %44 : vector<2x8x8xf32>
    %cst_19 = arith.constant dense<0xFF800000> : vector<2x8xf32>
    %46 = vector.multi_reduction <maximumf>, %45, %cst_19 [2] : vector<2x8x8xf32> to vector<2x8xf32>
    %47 = vector.shape_cast %46 : vector<2x8xf32> to vector<2x8x1xf32>
    %48 = vector.broadcast %47 : vector<2x8x1xf32> to vector<2x8x8xf32>
    %49 = arith.subf %45, %48 : vector<2x8x8xf32>
    %50 = math.exp %49 : vector<2x8x8xf32>
    %cst_20 = arith.constant dense<0.000000e+00> : vector<2x8xf32>
    %51 = vector.multi_reduction <add>, %50, %cst_20 [2] : vector<2x8x8xf32> to vector<2x8xf32>
    %52 = vector.shape_cast %51 : vector<2x8xf32> to vector<2x8x1xf32>
    %53 = tpu.reciprocal %52 {approx = true} : vector<2x8x1xf32> -> vector<2x8x1xf32>
    %54 = vector.broadcast %53 : vector<2x8x1xf32> to vector<2x8x8xf32>
    %55 = arith.mulf %50, %54 : vector<2x8x8xf32>
    "tpu.trace_start"() <{level = 10 : i32, message = "bnm,bmd->bnd"}> : () -> ()
    %cst_21 = arith.constant dense<0.000000e+00> : vector<2x8x8xf32>
    %56 = tpu.matmul %55, %42, %cst_21 {dimension_numbers = #tpu.dot_dimension_numbers<[2], [1], [1], [2], [0, 0, 0, 1, 1, 2], [0], [0]>} : vector<2x8x8xf32>, vector<2x8x8xf32>, vector<2x8x8xf32> -> vector<2x8x8xf32>
    "tpu.trace_stop"() : () -> ()
    %57 = vector.shape_cast %56 : vector<2x8x8xf32> to vector<16x8xf32>
    %58 = vector.extract_strided_slice %36 {offsets = [0, 0], sizes = [8, 32], strides = [1, 1]} : vector<32x32xf32> to vector<8x32xf32>
    %cst_22 = arith.constant dense<0.000000e+00> : vector<16x32xf32>
    %59 = tpu.matmul %57, %58, %cst_22 {dimension_numbers = #tpu.dot_dimension_numbers<[1], [0], [0], [1], [0, 0, 1, 1], [], []>} : vector<16x8xf32>, vector<8x32xf32>, vector<16x32xf32> -> vector<16x32xf32>
    %60 = vector.extract_strided_slice %33 {offsets = [0, 8], sizes = [16, 8], strides = [1, 1]} : vector<16x96xf32> to vector<16x8xf32>
    %61 = vector.shape_cast %60 : vector<16x8xf32> to vector<2x8x8xf32>
    %62 = vector.extract_strided_slice %33 {offsets = [0, 40], sizes = [16, 8], strides = [1, 1]} : vector<16x96xf32> to vector<16x8xf32>
    %63 = vector.shape_cast %62 : vector<16x8xf32> to vector<2x8x8xf32>
    %64 = vector.extract_strided_slice %33 {offsets = [0, 72], sizes = [16, 8], strides = [1, 1]} : vector<16x96xf32> to vector<16x8xf32>
    %65 = vector.shape_cast %64 : vector<16x8xf32> to vector<2x8x8xf32>
    "tpu.trace_start"() <{level = 10 : i32, message = "bnd,bmd->bnm"}> : () -> ()
    %cst_23 = arith.constant dense<0.000000e+00> : vector<2x8x8xf32>
    %66 = tpu.matmul %61, %63, %cst_23 {dimension_numbers = #tpu.dot_dimension_numbers<[2], [2], [1], [1], [0, 0, 0, 1, 1, 1], [0], [0]>} : vector<2x8x8xf32>, vector<2x8x8xf32>, vector<2x8x8xf32> -> vector<2x8x8xf32>
    "tpu.trace_stop"() : () -> ()
    %67 = vector.broadcast %35 : f32 to vector<2x8x8xf32>
    %68 = arith.mulf %66, %67 : vector<2x8x8xf32>
    %cst_24 = arith.constant dense<0xFF800000> : vector<2x8xf32>
    %69 = vector.multi_reduction <maximumf>, %68, %cst_24 [2] : vector<2x8x8xf32> to vector<2x8xf32>
    %70 = vector.shape_cast %69 : vector<2x8xf32> to vector<2x8x1xf32>
    %71 = vector.broadcast %70 : vector<2x8x1xf32> to vector<2x8x8xf32>
    %72 = arith.subf %68, %71 : vector<2x8x8xf32>
    %73 = math.exp %72 : vector<2x8x8xf32>
    %cst_25 = arith.constant dense<0.000000e+00> : vector<2x8xf32>
    %74 = vector.multi_reduction <add>, %73, %cst_25 [2] : vector<2x8x8xf32> to vector<2x8xf32>
    %75 = vector.shape_cast %74 : vector<2x8xf32> to vector<2x8x1xf32>
    %76 = tpu.reciprocal %75 {approx = true} : vector<2x8x1xf32> -> vector<2x8x1xf32>
    %77 = vector.broadcast %76 : vector<2x8x1xf32> to vector<2x8x8xf32>
    %78 = arith.mulf %73, %77 : vector<2x8x8xf32>
    "tpu.trace_start"() <{level = 10 : i32, message = "bnm,bmd->bnd"}> : () -> ()
    %cst_26 = arith.constant dense<0.000000e+00> : vector<2x8x8xf32>
    %79 = tpu.matmul %78, %65, %cst_26 {dimension_numbers = #tpu.dot_dimension_numbers<[2], [1], [1], [2], [0, 0, 0, 1, 1, 2], [0], [0]>} : vector<2x8x8xf32>, vector<2x8x8xf32>, vector<2x8x8xf32> -> vector<2x8x8xf32>
    "tpu.trace_stop"() : () -> ()
    %80 = vector.shape_cast %79 : vector<2x8x8xf32> to vector<16x8xf32>
    %81 = vector.extract_strided_slice %36 {offsets = [8, 0], sizes = [8, 32], strides = [1, 1]} : vector<32x32xf32> to vector<8x32xf32>
    %cst_27 = arith.constant dense<0.000000e+00> : vector<16x32xf32>
    %82 = tpu.matmul %80, %81, %cst_27 {dimension_numbers = #tpu.dot_dimension_numbers<[1], [0], [0], [1], [0, 0, 1, 1], [], []>} : vector<16x8xf32>, vector<8x32xf32>, vector<16x32xf32> -> vector<16x32xf32>
    %83 = arith.addf %59, %82 : vector<16x32xf32>
    %84 = vector.extract_strided_slice %33 {offsets = [0, 16], sizes = [16, 8], strides = [1, 1]} : vector<16x96xf32> to vector<16x8xf32>
    %85 = vector.shape_cast %84 : vector<16x8xf32> to vector<2x8x8xf32>
    %86 = vector.extract_strided_slice %33 {offsets = [0, 48], sizes = [16, 8], strides = [1, 1]} : vector<16x96xf32> to vector<16x8xf32>
    %87 = vector.shape_cast %86 : vector<16x8xf32> to vector<2x8x8xf32>
    %88 = vector.extract_strided_slice %33 {offsets = [0, 80], sizes = [16, 8], strides = [1, 1]} : vector<16x96xf32> to vector<16x8xf32>
    %89 = vector.shape_cast %88 : vector<16x8xf32> to vector<2x8x8xf32>
    "tpu.trace_start"() <{level = 10 : i32, message = "bnd,bmd->bnm"}> : () -> ()
    %cst_28 = arith.constant dense<0.000000e+00> : vector<2x8x8xf32>
    %90 = tpu.matmul %85, %87, %cst_28 {dimension_numbers = #tpu.dot_dimension_numbers<[2], [2], [1], [1], [0, 0, 0, 1, 1, 1], [0], [0]>} : vector<2x8x8xf32>, vector<2x8x8xf32>, vector<2x8x8xf32> -> vector<2x8x8xf32>
    "tpu.trace_stop"() : () -> ()
    %91 = vector.broadcast %35 : f32 to vector<2x8x8xf32>
    %92 = arith.mulf %90, %91 : vector<2x8x8xf32>
    %cst_29 = arith.constant dense<0xFF800000> : vector<2x8xf32>
    %93 = vector.multi_reduction <maximumf>, %92, %cst_29 [2] : vector<2x8x8xf32> to vector<2x8xf32>
    %94 = vector.shape_cast %93 : vector<2x8xf32> to vector<2x8x1xf32>
    %95 = vector.broadcast %94 : vector<2x8x1xf32> to vector<2x8x8xf32>
    %96 = arith.subf %92, %95 : vector<2x8x8xf32>
    %97 = math.exp %96 : vector<2x8x8xf32>
    %cst_30 = arith.constant dense<0.000000e+00> : vector<2x8xf32>
    %98 = vector.multi_reduction <add>, %97, %cst_30 [2] : vector<2x8x8xf32> to vector<2x8xf32>
    %99 = vector.shape_cast %98 : vector<2x8xf32> to vector<2x8x1xf32>
    %100 = tpu.reciprocal %99 {approx = true} : vector<2x8x1xf32> -> vector<2x8x1xf32>
    %101 = vector.broadcast %100 : vector<2x8x1xf32> to vector<2x8x8xf32>
    %102 = arith.mulf %97, %101 : vector<2x8x8xf32>
    "tpu.trace_start"() <{level = 10 : i32, message = "bnm,bmd->bnd"}> : () -> ()
    %cst_31 = arith.constant dense<0.000000e+00> : vector<2x8x8xf32>
    %103 = tpu.matmul %102, %89, %cst_31 {dimension_numbers = #tpu.dot_dimension_numbers<[2], [1], [1], [2], [0, 0, 0, 1, 1, 2], [0], [0]>} : vector<2x8x8xf32>, vector<2x8x8xf32>, vector<2x8x8xf32> -> vector<2x8x8xf32>
    "tpu.trace_stop"() : () -> ()
    %104 = vector.shape_cast %103 : vector<2x8x8xf32> to vector<16x8xf32>
    %105 = vector.extract_strided_slice %36 {offsets = [16, 0], sizes = [8, 32], strides = [1, 1]} : vector<32x32xf32> to vector<8x32xf32>
    %cst_32 = arith.constant dense<0.000000e+00> : vector<16x32xf32>
    %106 = tpu.matmul %104, %105, %cst_32 {dimension_numbers = #tpu.dot_dimension_numbers<[1], [0], [0], [1], [0, 0, 1, 1], [], []>} : vector<16x8xf32>, vector<8x32xf32>, vector<16x32xf32> -> vector<16x32xf32>
    %107 = arith.addf %83, %106 : vector<16x32xf32>
    %108 = vector.extract_strided_slice %33 {offsets = [0, 24], sizes = [16, 8], strides = [1, 1]} : vector<16x96xf32> to vector<16x8xf32>
    %109 = vector.shape_cast %108 : vector<16x8xf32> to vector<2x8x8xf32>
    %110 = vector.extract_strided_slice %33 {offsets = [0, 56], sizes = [16, 8], strides = [1, 1]} : vector<16x96xf32> to vector<16x8xf32>
    %111 = vector.shape_cast %110 : vector<16x8xf32> to vector<2x8x8xf32>
    %112 = vector.extract_strided_slice %33 {offsets = [0, 88], sizes = [16, 8], strides = [1, 1]} : vector<16x96xf32> to vector<16x8xf32>
    %113 = vector.shape_cast %112 : vector<16x8xf32> to vector<2x8x8xf32>
    "tpu.trace_start"() <{level = 10 : i32, message = "bnd,bmd->bnm"}> : () -> ()
    %cst_33 = arith.constant dense<0.000000e+00> : vector<2x8x8xf32>
    %114 = tpu.matmul %109, %111, %cst_33 {dimension_numbers = #tpu.dot_dimension_numbers<[2], [2], [1], [1], [0, 0, 0, 1, 1, 1], [0], [0]>} : vector<2x8x8xf32>, vector<2x8x8xf32>, vector<2x8x8xf32> -> vector<2x8x8xf32>
    "tpu.trace_stop"() : () -> ()
    %115 = vector.broadcast %35 : f32 to vector<2x8x8xf32>
    %116 = arith.mulf %114, %115 : vector<2x8x8xf32>
    %cst_34 = arith.constant dense<0xFF800000> : vector<2x8xf32>
    %117 = vector.multi_reduction <maximumf>, %116, %cst_34 [2] : vector<2x8x8xf32> to vector<2x8xf32>
    %118 = vector.shape_cast %117 : vector<2x8xf32> to vector<2x8x1xf32>
    %119 = vector.broadcast %118 : vector<2x8x1xf32> to vector<2x8x8xf32>
    %120 = arith.subf %116, %119 : vector<2x8x8xf32>
    %121 = math.exp %120 : vector<2x8x8xf32>
    %cst_35 = arith.constant dense<0.000000e+00> : vector<2x8xf32>
    %122 = vector.multi_reduction <add>, %121, %cst_35 [2] : vector<2x8x8xf32> to vector<2x8xf32>
    %123 = vector.shape_cast %122 : vector<2x8xf32> to vector<2x8x1xf32>
    %124 = tpu.reciprocal %123 {approx = true} : vector<2x8x1xf32> -> vector<2x8x1xf32>
    %125 = vector.broadcast %124 : vector<2x8x1xf32> to vector<2x8x8xf32>
    %126 = arith.mulf %121, %125 : vector<2x8x8xf32>
    "tpu.trace_start"() <{level = 10 : i32, message = "bnm,bmd->bnd"}> : () -> ()
    %cst_36 = arith.constant dense<0.000000e+00> : vector<2x8x8xf32>
    %127 = tpu.matmul %126, %113, %cst_36 {dimension_numbers = #tpu.dot_dimension_numbers<[2], [1], [1], [2], [0, 0, 0, 1, 1, 2], [0], [0]>} : vector<2x8x8xf32>, vector<2x8x8xf32>, vector<2x8x8xf32> -> vector<2x8x8xf32>
    "tpu.trace_stop"() : () -> ()
    %128 = vector.shape_cast %127 : vector<2x8x8xf32> to vector<16x8xf32>
    %129 = vector.extract_strided_slice %36 {offsets = [24, 0], sizes = [8, 32], strides = [1, 1]} : vector<32x32xf32> to vector<8x32xf32>
    %cst_37 = arith.constant dense<0.000000e+00> : vector<16x32xf32>
    %130 = tpu.matmul %128, %129, %cst_37 {dimension_numbers = #tpu.dot_dimension_numbers<[1], [0], [0], [1], [0, 0, 1, 1], [], []>} : vector<16x8xf32>, vector<8x32xf32>, vector<16x32xf32> -> vector<16x32xf32>
    %131 = arith.addf %107, %130 : vector<16x32xf32>
    %c0_38 = arith.constant 0 : index
    %c0_39 = arith.constant 0 : index
    %132 = vector.load %arg6[%c0_38, %c0_39] : memref<1x32xf32, #tpu.memory_space<vmem>>, vector<1x32xf32>
    %133 = vector.broadcast %132 : vector<1x32xf32> to vector<16x32xf32>
    %134 = arith.addf %131, %133 : vector<16x32xf32>
    %135 = arith.addf %4, %134 : vector<16x32xf32>
    %c0_40 = arith.constant 0 : index
    %c0_41 = arith.constant 0 : index
    %136 = vector.load %arg7[%c0_40, %c0_41] : memref<1x32xf32, #tpu.memory_space<vmem>>, vector<1x32xf32>
    %c0_42 = arith.constant 0 : index
    %c0_43 = arith.constant 0 : index
    %137 = vector.load %arg8[%c0_42, %c0_43] : memref<1x32xf32, #tpu.memory_space<vmem>>, vector<1x32xf32>
    %cst_44 = arith.constant dense<0.000000e+00> : vector<16xf32>
    %138 = vector.multi_reduction <add>, %135, %cst_44 [1] : vector<16x32xf32> to vector<16xf32>
    %139 = vector.shape_cast %138 : vector<16xf32> to vector<16x1xf32>
    %cst_45 = arith.constant 3.200000e+01 : f32
    %140 = vector.broadcast %cst_45 : f32 to vector<16x1xf32>
    %141 = arith.divf %139, %140 : vector<16x1xf32>
    %142 = vector.broadcast %141 : vector<16x1xf32> to vector<16x32xf32>
    %143 = arith.subf %135, %142 : vector<16x32xf32>
    %144 = arith.mulf %143, %143 : vector<16x32xf32>
    %cst_46 = arith.constant dense<0.000000e+00> : vector<16xf32>
    %145 = vector.multi_reduction <add>, %144, %cst_46 [1] : vector<16x32xf32> to vector<16xf32>
    %146 = vector.shape_cast %145 : vector<16xf32> to vector<16x1xf32>
    %cst_47 = arith.constant 3.200000e+01 : f32
    %147 = vector.broadcast %cst_47 : f32 to vector<16x1xf32>
    %148 = arith.divf %146, %147 : vector<16x1xf32>
    %149 = vector.broadcast %141 : vector<16x1xf32> to vector<16x32xf32>
    %150 = arith.subf %135, %149 : vector<16x32xf32>
    %cst_48 = arith.constant 9.99999974E-6 : f32
    %151 = vector.broadcast %cst_48 : f32 to vector<16x1xf32>
    %152 = arith.addf %148, %151 : vector<16x1xf32>
    %153 = math.rsqrt %152 : vector<16x1xf32>
    %154 = vector.broadcast %153 : vector<16x1xf32> to vector<16x32xf32>
    %155 = arith.mulf %150, %154 : vector<16x32xf32>
    %156 = vector.broadcast %136 : vector<1x32xf32> to vector<16x32xf32>
    %157 = arith.mulf %155, %156 : vector<16x32xf32>
    %158 = vector.broadcast %137 : vector<1x32xf32> to vector<16x32xf32>
    %159 = arith.addf %157, %158 : vector<16x32xf32>
    %c0_i32_49 = arith.constant 0 : i32
    %160 = tpu.memref_slice %arg16[%c0_i32_49] : memref<2x!tpu.dma_semaphore, #tpu.memory_space<semaphore_mem>> -> memref<1x!tpu.dma_semaphore, #tpu.memory_space<semaphore_mem>>
    %161 = tpu.memref_squeeze %160 : memref<1x!tpu.dma_semaphore, #tpu.memory_space<semaphore_mem>> -> memref<!tpu.dma_semaphore, #tpu.memory_space<semaphore_mem>>
    tpu.wait_dma2 semaphore(%161 : memref<!tpu.dma_semaphore, #tpu.memory_space<semaphore_mem>>) src(%arg9 : memref<32x2048xbf16, #tpu.memory_space<any>>) dst(%arg14 : memref<32x2048xbf16, #tpu.memory_space<vmem>>)
    %c1_i32_50 = arith.constant 1 : i32
    %162 = tpu.memref_slice %arg16[%c1_i32_50] : memref<2x!tpu.dma_semaphore, #tpu.memory_space<semaphore_mem>> -> memref<1x!tpu.dma_semaphore, #tpu.memory_space<semaphore_mem>>
    %163 = tpu.memref_squeeze %162 : memref<1x!tpu.dma_semaphore, #tpu.memory_space<semaphore_mem>> -> memref<!tpu.dma_semaphore, #tpu.memory_space<semaphore_mem>>
    tpu.wait_dma2 semaphore(%163 : memref<!tpu.dma_semaphore, #tpu.memory_space<semaphore_mem>>) src(%arg11 : memref<32x2048xbf16, #tpu.memory_space<any>>) dst(%arg15 : memref<32x2048xbf16, #tpu.memory_space<vmem>>)
    %164 = arith.truncf %159 : vector<16x32xf32> to vector<16x32xbf16>
    %c0_51 = arith.constant 0 : index
    %c0_52 = arith.constant 0 : index
    %165 = vector.load %arg14[%c0_51, %c0_52] : memref<32x2048xbf16, #tpu.memory_space<vmem>>, vector<32x2048xbf16>
    %cst_53 = arith.constant dense<0.000000e+00> : vector<16x2048xf32>
    %166 = tpu.matmul %164, %165, %cst_53 {dimension_numbers = #tpu.dot_dimension_numbers<[1], [0], [0], [1], [0, 0, 1, 1], [], []>} : vector<16x32xbf16>, vector<32x2048xbf16>, vector<16x2048xf32> -> vector<16x2048xf32>
    %c0_54 = arith.constant 0 : index
    %c0_55 = arith.constant 0 : index
    %167 = vector.load %arg10[%c0_54, %c0_55] : memref<1x2048xf32, #tpu.memory_space<vmem>>, vector<1x2048xf32>
    %168 = vector.broadcast %167 : vector<1x2048xf32> to vector<16x2048xf32>
    %169 = arith.addf %166, %168 : vector<16x2048xf32>
    %170 = arith.negf %169 : vector<16x2048xf32>
    %171 = math.exp %170 : vector<16x2048xf32>
    %cst_56 = arith.constant 1.000000e+00 : f32
    %172 = vector.broadcast %cst_56 : f32 to vector<16x2048xf32>
    %173 = arith.addf %172, %171 : vector<16x2048xf32>
    %174 = arith.divf %172, %173 : vector<16x2048xf32>
    %175 = arith.mulf %169, %174 : vector<16x2048xf32>
    %176 = arith.truncf %175 : vector<16x2048xf32> to vector<16x2048xbf16>
    %c0_57 = arith.constant 0 : index
    %c0_58 = arith.constant 0 : index
    %177 = vector.load %arg15[%c0_57, %c0_58] : memref<32x2048xbf16, #tpu.memory_space<vmem>>, vector<32x2048xbf16>
    %cst_59 = arith.constant dense<0.000000e+00> : vector<16x32xf32>
    %178 = tpu.matmul %176, %177, %cst_59 {dimension_numbers = #tpu.dot_dimension_numbers<[1], [1], [0], [0], [0, 0, 1, 0], [], []>} : vector<16x2048xbf16>, vector<32x2048xbf16>, vector<16x32xf32> -> vector<16x32xf32>
    %c0_60 = arith.constant 0 : index
    %c0_61 = arith.constant 0 : index
    %179 = vector.load %arg12[%c0_60, %c0_61] : memref<1x32xf32, #tpu.memory_space<vmem>>, vector<1x32xf32>
    %180 = vector.broadcast %179 : vector<1x32xf32> to vector<16x32xf32>
    %181 = arith.addf %178, %180 : vector<16x32xf32>
    %182 = arith.addf %135, %181 : vector<16x32xf32>
    %c0_62 = arith.constant 0 : index
    %c0_63 = arith.constant 0 : index
    %183 = vector.load %arg13[%c0_62, %c0_63] : memref<16x32xf32, #tpu.memory_space<vmem>>, vector<16x32xf32>
    tpu.vector_store %arg13[%c0_62, %c0_63], %182 {strides = array<i32>} : memref<16x32xf32, #tpu.memory_space<vmem>>, vector<16x32xf32>,
    return
  }
}

</mosaic_0001>

<bundles_post_ra>
// kernel: transformer_block.1
= control target key start
LH: loop header
LB: loop body
LE: loop exit
PB: predicated region body
PF: predicated region fallthrough
CT: control target
= control target key end

     0   :  { %18 = vsyncpa [#allocation6], 0  ;;  %s4301_s0 = inlined_call_operand.hbm [shape: f32[16,32], index: 0, kind: input, shape index: {}]   ;;  %s4302_s1 = inlined_call_operand.vmem [shape: f32[1,32], index: 1, kind: input, shape index: {}]   ;;  %s4303_s2 = inlined_call_operand.vmem [shape: f32[1,32], index: 2, kind: input, shape index: {}]   ;;  %s4304_s3 = inlined_call_operand.hbm [shape: f32[32,96], index: 3, kind: input, shape index: {}]   ;;  %s4305_s4 = inlined_call_operand.vmem [shape: f32[1,96], index: 4, kind: input, shape index: {}]   ;;  %s4306_s5 = inlined_call_operand.hbm [shape: f32[32,32], index: 5, kind: input, shape index: {}]   ;;  %s4307_s6 = inlined_call_operand.vmem [shape: f32[1,32], index: 6, kind: input, shape index: {}]   ;;  %s4308_s7 = inlined_call_operand.vmem [shape: f32[1,32], index: 7, kind: input, shape index: {}]   ;;  %s4309_s8 = inlined_call_operand.vmem [shape: f32[1,32], index: 8, kind: input, shape index: {}]   ;;  %s4310_s9 = inlined_call_operand.hbm [shape: bf16[32,2048], index: 9, kind: input, shape index: {}]   ;;  %s4311_s10 = inlined_call_operand.vmem [shape: f32[1,2048], index: 10, kind: input, shape index: {}]   ;;  %s4312_s11 = inlined_call_operand.hbm [shape: bf16[32,2048], index: 11, kind: input, shape index: {}]   ;;  %s4313_s12 = inlined_call_operand.vmem [shape: f32[1,32], index: 12, kind: input, shape index: {}]   ;;  %s4314_s13 = inlined_call_operand.hbm [shape: f32[16,32], index: 13, kind: output, shape index: {}]  }
   0x1   :  { %19 = vsyncpa [#allocation9], 0 }
   0x2   :  { %20 = vsyncpa [#allocation7], 0  ;;  %s3678_s25 = smov [#allocation8]   ;;  %s3679_s27 = smov [#allocation5]  }
   0x3   :  { %s42_s26 = sshll.u32 %s3678_s25, 4  ;;  %s26_s28 = sshll.u32 %s3679_s27, 4  ;;  %s43_s26 = int_to_ptr.vmem [resolvable:$true] %s42_s26  ;;  %s3779_s28 = int_to_ptr.vmem [resolvable:$true] %s26_s28 }
   0x4   :  { %s3580_s14 = scalar_lea.hbm %s4304_s3, 512 }
   0x5   :  { %p3581_p0 = scmp.ne.s32.totalorder %s4304_s3, %s3580_s14  ;;  %p3584_p1 = scmp.lt.u32.totalorder %s3580_s14, %s4304_s3 }
   0x7   :  { %p3586_p2 = pnand %p3584_p1, %p3581_p0 }
   0x9   :  { %3589 = shalt.err (!%p3586_p2)
}
   0xa   :  { %s3590_s19 = scalar_lea.vmem %s43_s26, 512  ;;  %p3595_p4 = scmp.lt.s32.totalorder %s43_s26, %s43_s26 }
   0xb   :  { %p3591_p3 = scmp.ne.s32.totalorder %s43_s26, %s3590_s19  ;;  %p3596_p5 = scmp.lt.s32.totalorder %s3590_s19, %s3590_s19 }
   0xd   :  { %p3597_p6 = por %p3596_p5, %p3595_p4 }
   0xf   :  { %p3598_p7 = pnand %p3597_p6, %p3591_p3 }
  0x11   :  { %3601 = shalt.err (!%p3598_p7)
}
  0x12   :  { %s3680_s20 = smov 128   ;;  %s3681_s21 = smov 8  }
  0x13   :  { %48 = dma.hbm_to_vmem [thread:$0]  %s4304_s3, 512, %s43_s26, [#allocation9], %s3680_s20, %s3680_s20, %s3681_s21  }
  0x14   :  { %s3602_s27 = scalar_lea.hbm %s4301_s0, 256 }
  0x15   :  { %p3603_p8 = scmp.ne.s32.totalorder %s4301_s0, %s3602_s27  ;;  %p3606_p9 = scmp.lt.u32.totalorder %s3602_s27, %s4301_s0 }
  0x17   :  { %p3608_p10 = pnand %p3606_p9, %p3603_p8 }
  0x19   :  { %3611 = shalt.err (!%p3608_p10)
}
  0x1a   :  { %s3612_s16 = scalar_lea.vmem %s3779_s28, 256  ;;  %p3617_p12 = scmp.lt.s32.totalorder %s3779_s28, %s3779_s28 }
  0x1b   :  { %p3613_p11 = scmp.ne.s32.totalorder %s3779_s28, %s3612_s16  ;;  %p3618_p13 = scmp.lt.s32.totalorder %s3612_s16, %s3612_s16 }
  0x1d   :  { %p3619_p0 = por %p3618_p13, %p3617_p12 }
  0x1f   :  { %p3620_p1 = pnand %p3619_p0, %p3613_p11 }
  0x21   :  { %3623 = shalt.err (!%p3620_p1)
}
  0x22   :  { %32 = dma.hbm_to_vmem [thread:$0]  %s4301_s0, 256, %s3779_s28, [#allocation6], %s3680_s20, %s3680_s20, %s3681_s21  }
  0x23   :  { %s3682_s17 = smov [#allocation10]   ;;  %s3624_s23 = scalar_lea.hbm %s4306_s5, 512 }
  0x24   :  { %s56_s18 = sshll.u32 %s3682_s17, 4  ;;  %p3625_p2 = scmp.ne.s32.totalorder %s4306_s5, %s3624_s23  ;;  %s57_s18 = int_to_ptr.vmem [resolvable:$true] %s56_s18 }
  0x25   :  { %p3628_p3 = scmp.lt.u32.totalorder %s3624_s23, %s4306_s5 }
  0x27   :  { %p3630_p4 = pnand %p3628_p3, %p3625_p2 }
  0x29   :  { %3633 = shalt.err (!%p3630_p4)
}
  0x2a   :  { %s3634_s30 = scalar_lea.vmem %s57_s18, 512  ;;  %p3639_p6 = scmp.lt.s32.totalorder %s57_s18, %s57_s18 }
  0x2b   :  { %p3635_p5 = scmp.ne.s32.totalorder %s57_s18, %s3634_s30  ;;  %p3640_p7 = scmp.lt.s32.totalorder %s3634_s30, %s3634_s30 }
  0x2d   :  { %p3641_p8 = por %p3640_p7, %p3639_p6 }
  0x2f   :  { %p3642_p9 = pnand %p3641_p8, %p3635_p5 }
  0x31   :  { %3645 = shalt.err (!%p3642_p9)
}
  0x32   :  { %62 = dma.hbm_to_vmem [thread:$0]  %s4306_s5, 512, %s57_s18, [#allocation9], %s3680_s20, %s3680_s20, %s3681_s21  }
  0x33   :  { %3668 = dma.done.wait [#allocation6], 256  }
  0x34   :  { %3669 = vsyncadd [#allocation6], 4294967040 }
  0x35   :  { %3670 = dma.done.wait [#allocation9], 1024  }
  0x36   :  { %3671 = vsyncadd [#allocation9], 4294966272  ;;  %s87_s14 = sld [smem:[#allocation0]]   ;;  %s3683_s15 = smov 64   ;;  %vm157_vm0 = vcmask 261120   ;;  %v3695_v36 = vmov 0.0  }
  0x37   :  { %105 = sst [smem:[#allocation13 + $0x3]] %s3683_s15  ;;  %s3684_s16 = smov [#allocation2]   ;;  %3267 = vmatprep.subr.mxu1 %v3695_v36  ;;  %vm3696_vm1 = vmmov 0   ;;  %vm300_vm2 = vcmask 64512  }
  0x38   :  { %107 = sst [smem:[#allocation13 + $0x4]] %s3680_s20  ;;  %s95_s3 = sshll.u32 %s3684_s16, 4  ;;  %3269 = vmatprep.mubr.msk.f32.mxu1 %vm3696_vm1, %v3695_v36  ;;  %s96_s3 = int_to_ptr.vmem [resolvable:$true] %s95_s3 }
  0x39   :  { %113 = sst [smem:[#allocation13 + $0x7]] %s3683_s15  ;;  %s3685_s26 = smov 2048  }
  0x3a   :  { %99 = sst [smem:[#allocation13]] %s3685_s26  ;;  %s3686_s5 = smov 16  }
  0x3b   :  { %101 = sst [smem:[#allocation13 + $0x1]] %s3685_s26  ;;  %s3687_s19 = smov 2  }
  0x3c   :  { %s3119_s17 = sshll.u32 %s87_s14, 26  ;;  %103 = sst [smem:[#allocation13 + $0x2]] %s3686_s5 }
  0x3d   :  { %s3120_s18 = sadd.s32 134217728, %s3119_s17  ;;  %109 = sst [smem:[#allocation13 + $0x5]] %s3687_s19 }
  0x3e   :  { %s3688_s22 = smov 1024   ;;  %s3689_s23 = smov 4  }
  0x3f   :  { %111 = sst [smem:[#allocation13 + $0x6]] %s3688_s22  ;;  %s3690_s24 = smov [#allocation4]  }
  0x40   :  { %115 = sst [smem:[#allocation13 + $0x8]] %s3689_s23  ;;  %s3691_s25 = smov [#allocation12]  }
  0x41   :  { %117 = dma.general %s4310_s9, 4096, %s96_s3, %s3690_s24, %s3691_s25, [#allocation13], %s3120_s18, 0  }
  0x42   :  { %134 = sst [smem:[#allocation15]] %s3685_s26  ;;  %s3692_s30 = smov [#allocation3]  }
  0x43   :  { %136 = sst [smem:[#allocation15 + $0x1]] %s3685_s26  ;;  %s130_s0 = sshll.u32 %s3692_s30, 4  ;;  %s131_s0 = int_to_ptr.vmem [resolvable:$true] %s130_s0 }
  0x44   :  { %138 = sst [smem:[#allocation15 + $0x2]] %s3686_s5  ;;  %s3693_s28 = smov [#allocation4 + $0x1]  }
  0x45   :  { %140 = sst [smem:[#allocation15 + $0x3]] %s3683_s15  ;;  %s3694_s14 = smov [#allocation14]  }
  0x46   :  { %142 = sst [smem:[#allocation15 + $0x4]] %s3680_s20  ;;  %s3697_s5 = smov 96  }
  0x47   :  { %144 = sst [smem:[#allocation15 + $0x5]] %s3687_s19  ;;  %s3700_s19 = smov 80  }
  0x48   :  { %146 = sst [smem:[#allocation15 + $0x6]] %s3688_s22  ;;  %s3702_s22 = smov 112  }
  0x49   :  { %148 = sst [smem:[#allocation15 + $0x7]] %s3683_s15  ;;  %s3704_s24 = smov 72  }
  0x4a   :  { %150 = sst [smem:[#allocation15 + $0x8]] %s3689_s23  ;;  %s3703_s23 = smov 48  }
  0x4b   :  { %152 = dma.general %s4312_s11, 4096, %s131_s0, %s3693_s28, %s3694_s14, [#allocation15], %s3120_s18, 0  }
  0x4c   :  { %v3843_v0 = vld [vmem:[#allocation5] sm:$0xff]  ;;  %v3845_v1 = vld [vmem:[#allocation5 + $0x8] sm:$0xff]  ;;  %v201_v14 = vld [vmem:[#allocation8] sm:$0xff]  ;;  %s3699_s18 = smov 120   ;;  %s3705_s25 = smov 104  }
  0x4d   :  { %v158_v2 = vsel %vm157_vm0, %v3843_v0, 0.0  ;;  %v161_v3 = vsel %vm157_vm0, %v3845_v1, 0.0  ;;  %v202_v15 = vld [vmem:[#allocation8 + $0x8] sm:$0xff]  ;;  %v203_v16 = vld [vmem:[#allocation8 + $0x10] sm:$0xff]  ;;  %v204_v18 = vld [vmem:[#allocation8 + $0x18] sm:$0xff]  ;;  %s3706_s27 = smov 40  }
  0x4e   :  { %159 = vadd.xlane.f32.xlu0 %v158_v2  ;;  %v3367_v17 = vpack.c.bf16 %v202_v15, %v201_v14  ;;  %v3371_v19 = vpack.c.bf16 %v204_v18, %v203_v16  ;;  %v3123_v27 = vld [vmem:[%s4302_s1] ss:$0 sm:$0xff] }
  0x4f   :  { %v3124_v29 = vld [vmem:[%s4303_s2] ss:$0 sm:$0xff] }
  0x50   :  { %3368 = vmatprep.subr.bf16.mxu0 %v3367_v17  ;;  %v3125_v37 = vld [vmem:[%s4305_s4] ss:$0 sm:$0xff]  ;;  %s3698_s4 = smov 88  }
  0x51   :  { %3370 = vmatpush3.bf16.msra.mxu0 %v3367_v17 }
  0x52   :  { %162 = vadd.xlane.f32.xlu0 %v161_v3  ;;  %3372 = vmatprep.subr.bf16.mxu0 %v3371_v19 }
  0x55   :  { %3374 = vmatpush3.bf16.msra.mxu0 %v3371_v19 }
  0x56   :  { %3287 = vmatprep.subr.mxu0 %v3695_v36 }
  0xdb   :  { %v160_v4 = vpop.xlane.xlu0 %159 }
  0xdc   :  { %v165_v5 = vmul.f32 0.03125, %v160_v4 }
  0xde   :  { %v167_v6 = vsub.f32 %v3843_v0, %v165_v5 }
  0xdf   :  { %v163_v7 = vpop.xlane.xlu0 %162 }
  0xe0   :  { %v166_v8 = vmul.f32 0.03125, %v163_v7  ;;  %v169_v9 = vmul.f32 %v167_v6, %v167_v6 }
  0xe2   :  { %v168_v10 = vsub.f32 %v3845_v1, %v166_v8  ;;  %v171_v11 = vsel %vm157_vm0, %v169_v9, 0.0 }
  0xe3   :  { %172 = vadd.xlane.f32.xlu1 %v171_v11 }
  0xe4   :  { %v170_v12 = vmul.f32 %v168_v10, %v168_v10 }
  0xe6   :  { %v174_v13 = vsel %vm157_vm0, %v170_v12, 0.0 }
  0xe7   :  { %175 = vadd.xlane.f32.xlu1 %v174_v13 }
 0x170   :  { %v173_v20 = vpop.xlane.xlu1 %172 }
 0x171   :  { %v177_v21 = vmul.f32 0.03125, %v173_v20 }
 0x173   :  { %v179_v22 = vadd.f32 1e-05, %v177_v21 }
 0x174   :  { %v176_v23 = vpop.xlane.xlu1 %175 }
 0x175   :  { %3412 = vrsqrt.f32 %v179_v22  ;;  %v178_v24 = vmul.f32 0.03125, %v176_v23 }
 0x177   :  { %v180_v25 = vadd.f32 1e-05, %v178_v24 }
 0x179   :  { %3414 = vrsqrt.f32 %v180_v25 }
 0x17f   :  { %v3413_v26 = vpop.eup %3412 }
 0x180   :  { %v183_v28 = vmul.f32 %v3413_v26, %v167_v6 }
 0x182   :  { %v191_v30 = vmul.f32 %v3123_v27, %v183_v28 }
 0x183   :  { %v3415_v31 = vpop.eup %3414 }
 0x184   :  { %v184_v32 = vmul.f32 %v3415_v31, %v168_v10  ;;  %v199_v33 = vadd.f32 %v3124_v29, %v191_v30 }
 0x186   :  { %v192_v34 = vmul.f32 %v3123_v27, %v184_v32  ;;  %3264 = vmatprep.mubr.msk.f32.mxu0 %vm157_vm0, %v199_v33 }
 0x188   :  { %v200_v35 = vadd.f32 %v3124_v29, %v192_v34 }
 0x18a   :  { %3265 = vmatmul.mubr.msk.f32.vlgmr.msra.gmra.mrb[0].mxu0 %vm157_vm0, %v200_v35 }
 0x18b   :  { %3289 = vmatprep.mubr.msk.f32.mxu0 %vm3696_vm1, %v3695_v36 }
 0x25d   :  { %v3266_v38 = vpop.f32.mrb[0].mxu0 }
 0x25e   :  { %v3872_v39 = vadd.f32 %v3266_v38, %v3125_v37  ;;  %v284_v40 = vpop.f32.mrb[1].mxu0 }
 0x25f   :  { %v3874_v41 = vadd.f32 %v3125_v37, %v284_v40 }
 0x260   :  { %376 = vrot.lane.b32.xlu1 %v3872_v39, %s3697_s5 }
 0x261   :  { %298 = vrot.lane.b32.xlu0 %v3874_v41, %s3697_s5 }
 0x2d2   :  { %v377_v43 = vpop.permute.xlu1 %376 }
 0x2d3   :  { %v299_v42 = vpop.permute.xlu0 %298 }
 0x2d4   :  { %3268 = vmatpush3.xpose.msk.msra.mxu1 %vm300_vm2, %v299_v42 }
 0x2d5   :  { %3272 = vmatprep.subr.mxu1 %v3695_v36 }
 0x2d7   :  { %3270 = vmatmul.mubr.msk.f32.vlgmr.msra.gmra.mrb[0].mxu1 %vm300_vm2, %v3874_v41 }
 0x2d8   :  { %3273 = vmatpush3.xpose.msk.msra.mxu1 %vm300_vm2, %v377_v43  ;;  %3274 = vmatprep.mubr.msk.f32.mxu1 %vm3696_vm1, %v3695_v36 }
 0x2d9   :  { %3277 = vmatprep.subr.mxu1 %v3695_v36 }
 0x2db   :  { %3275 = vmatmul.mubr.msk.f32.vlgmr.msra.gmra.mrb[2].mxu1 %vm300_vm2, %v3872_v39 }
 0x2dc   :  { %3279 = vmatprep.mubr.msk.f32.mxu1 %vm3696_vm1, %v3695_v36 }
 0x3aa   :  { %v371_v44 = vpop.f32.mrb[0].mxu1 }
 0x3ab   :  { %v452_v45 = vmul.f32 0.17677669, %v371_v44  ;;  %v3271_v46 = vpop.f32.mrb[1].mxu1 }
 0x3ad   :  { %v454_v47 = vsel %vm300_vm2, %v452_v45, -inf }
 0x3ae   :  { %455 = vmax.xlane.f32.xlu1 %v454_v47  ;;  %v448_v48 = vpop.f32.mrb[2].mxu1 }
 0x3af   :  { %v453_v49 = vmul.f32 0.17677669, %v448_v48  ;;  %v3276_v50 = vpop.f32.mrb[3].mxu1 }
 0x3b1   :  { %v457_v51 = vsel %vm300_vm2, %v453_v49, -inf }
 0x3b2   :  { %458 = vmax.xlane.f32.xlu0 %v457_v51 }
 0x3bf   :  { %552 = vrot.lane.b32.xlu1 %v3872_v39, %s3683_s15 }
 0x3c3   :  { %708 = vrot.lane.b32.xlu1 %v3872_v39, %s3698_s4 }
 0x43b   :  { %v456_v52 = vpop.xlane.xlu1 %455 }
 0x43c   :  { %v460_v53 = vsub.f32 %v452_v45, %v456_v52 }
 0x43e   :  { %v462_v54 = vmul.f32 1.442695, %v460_v53 }
 0x43f   :  { %v459_v55 = vpop.xlane.xlu0 %458  ;;  %v553_v62 = vpop.permute.xlu1 %552 }
 0x440   :  { %3416 = vpow2.f32 %v462_v54  ;;  %v461_v56 = vsub.f32 %v453_v49, %v459_v55 }
 0x442   :  { %v464_v57 = vmul.f32 1.442695, %v461_v56 }
 0x443   :  { %v709_v63 = vpop.permute.xlu1 %708 }
 0x444   :  { %3418 = vpow2.f32 %v464_v57 }
 0x44a   :  { %v3417_v58 = vpop.eup %3416 }
 0x44b   :  { %v466_v59 = vsel %vm300_vm2, %v3417_v58, 0.0 }
 0x44c   :  { %467 = vadd.xlane.f32.xlu0 %v466_v59 }
 0x44e   :  { %v3419_v60 = vpop.eup %3418 }
 0x44f   :  { %v469_v61 = vsel %vm300_vm2, %v3419_v60, 0.0 }
 0x450   :  { %470 = vadd.xlane.f32.xlu1 %v469_v61  ;;  %v293_v61 = vld [vmem:[#allocation10] sm:$0xff] }
 0x461   :  { %706 = vrot.lane.b32.xlu1 %v3872_v39, %s3699_s18 }
 0x462   :  { %476 = vrot.lane.b32.xlu0 %v3874_v41, %s3683_s15  ;;  %s3701_s15 = smov 56  }
 0x465   :  { %628 = vrot.lane.b32.xlu1 %v3874_v41, %s3699_s18 }
 0x466   :  { %630 = vrot.lane.b32.xlu0 %v3874_v41, %s3698_s4 }
 0x469   :  { %1124 = vrot.lane.b32.xlu1 %v3874_v41, %s3700_s19 }
 0x4d9   :  { %v468_v2 = vpop.xlane.xlu0 %467 }
 0x4da   :  { %3420 = vrcp.f32 %v468_v2 }
 0x4dd   :  { %v471_v3 = vpop.xlane.xlu1 %470  ;;  %v477_v4 = vpop.permute.xlu0 %476 }
 0x4de   :  { %3422 = vrcp.f32 %v471_v3  ;;  %3278 = vmatpush3.msra.mxu1 %v477_v4 }
 0x4df   :  { %3282 = vmatprep.subr.mxu1 %v3695_v36 }
 0x4e1   :  { %v707_v5 = vpop.permute.xlu1 %706  ;;  %v631_v6 = vpop.permute.xlu0 %630 }
 0x4e2   :  { %3288 = vmatpush3.xpose.msk.msra.mxu0 %vm300_vm2, %v631_v6 }
 0x4e3   :  { %3297 = vmatprep.subr.mxu0 %v3695_v36 }
 0x4e4   :  { %v3421_v7 = vpop.eup %3420 }
 0x4e5   :  { %v474_v8 = vmul.f32 %v3421_v7, %v3417_v58  ;;  %v629_v9 = vpop.permute.xlu1 %628 }
 0x4e6   :  { %3290 = vmatmul.mubr.msk.f32.vlgmr.msra.gmra.mrb[2].mxu0 %vm300_vm2, %v629_v9 }
 0x4e7   :  { %3280 = vmatmul.mubr.msk.f32.vlgmr.msra.gmra.mrb[4].mxu1 %vm300_vm2, %v474_v8  ;;  %3299 = vmatprep.mubr.msk.f32.mxu0 %vm3696_vm1, %v3695_v36 }
 0x4e8   :  { %v3423_v10 = vpop.eup %3422  ;;  %3283 = vmatpush3.msra.mxu1 %v553_v62  ;;  %3284 = vmatprep.mubr.msk.f32.mxu1 %vm3696_vm1, %v3695_v36 }
 0x4e9   :  { %v475_v11 = vmul.f32 %v3423_v10, %v3419_v60  ;;  %3292 = vmatprep.subr.mxu1 %v3695_v36  ;;  %v1125_v30 = vpop.permute.xlu1 %1124  ;;  %v294_v60 = vld [vmem:[#allocation10 + $0x8] sm:$0xff] }
 0x4eb   :  { %3285 = vmatmul.mubr.msk.f32.vlgmr.msra.gmra.mrb[6].mxu1 %vm300_vm2, %v475_v11 }
 0x4ec   :  { %3294 = vmatprep.mubr.msk.f32.mxu1 %vm3696_vm1, %v3695_v36 }
 0x4ef   :  { %3293 = vmatpush3.xpose.msk.msra.mxu1 %vm300_vm2, %v709_v63 }
 0x4f0   :  { %3302 = vmatprep.subr.mxu1 %v3695_v36 }
 0x4f2   :  { %3295 = vmatmul.mubr.msk.f32.vlgmr.msra.gmra.mrb[8].mxu1 %vm300_vm2, %v707_v5 }
 0x4f3   :  { %3304 = vmatprep.mubr.msk.f32.mxu1 %vm3696_vm1, %v3695_v36 }
 0x5b9   :  { %v702_v12 = vpop.f32.mrb[2].mxu0 }
 0x5ba   :  { %v3922_v13 = vpop.f32.mrb[4].mxu1  ;;  %v3291_v14 = vpop.f32.mrb[3].mxu0  ;;  %v784_v28 = vmul.f32 0.17677669, %v702_v12 }
 0x5bb   :  { %v3281_v15 = vpop.f32.mrb[5].mxu1 }
 0x5bc   :  { %v786_v29 = vsel %vm300_vm2, %v784_v28, -inf  ;;  %v295_v15 = vld [vmem:[#allocation10 + $0x10] sm:$0xff] }
 0x5be   :  { %v3924_v16 = vpop.f32.mrb[6].mxu1 }
 0x5bf   :  { %v3286_v17 = vpop.f32.mrb[7].mxu1 }
 0x5c5   :  { %v780_v18 = vpop.f32.mrb[8].mxu1 }
 0x5c6   :  { %v785_v19 = vmul.f32 0.17677669, %v780_v18  ;;  %v3296_v20 = vpop.f32.mrb[9].mxu1 }
 0x5c8   :  { %v789_v21 = vsel %vm300_vm2, %v785_v19, -inf }
 0x5c9   :  { %790 = vmax.xlane.f32.xlu0 %v789_v21 }
 0x5df   :  { %884 = vrot.lane.b32.xlu0 %v3872_v39, %s3701_s15 }
 0x5e3   :  { %1122 = vrot.lane.b32.xlu0 %v3874_v41, %s3702_s22 }
 0x5e7   :  { %1200 = vrot.lane.b32.xlu0 %v3872_v39, %s3702_s22 }
 0x656   :  { %v791_v22 = vpop.xlane.xlu0 %790 }
 0x657   :  { %v793_v23 = vsub.f32 %v785_v19, %v791_v22 }
 0x659   :  { %v796_v24 = vmul.f32 1.442695, %v793_v23 }
 0x65a   :  { %v885_v25 = vpop.permute.xlu0 %884 }
 0x65b   :  { %3424 = vpow2.f32 %v796_v24  ;;  %3303 = vmatpush3.msra.mxu1 %v885_v25 }
 0x65c   :  { %3317 = vmatprep.subr.mxu1 %v3695_v36 }
 0x65e   :  { %v1123_v34 = vpop.permute.xlu0 %1122 }
 0x662   :  { %v1201_v37 = vpop.permute.xlu0 %1200 }
 0x665   :  { %v3425_v26 = vpop.eup %3424 }
 0x666   :  { %v801_v27 = vsel %vm300_vm2, %v3425_v26, 0.0 }
 0x667   :  { %802 = vadd.xlane.f32.xlu1 %v801_v27 }
 0x678   :  { %1202 = vrot.lane.b32.xlu1 %v3872_v39, %s3700_s19 }
 0x69c   :  { %787 = vmax.xlane.f32.xlu1 %v786_v29 }
 0x6f4   :  { %v803_v31 = vpop.xlane.xlu1 %802 }
 0x6f5   :  { %3426 = vrcp.f32 %v803_v31 }
 0x6f8   :  { %v1203_v35 = vpop.permute.xlu1 %1202 }
 0x6ff   :  { %v3427_v32 = vpop.eup %3426 }
 0x700   :  { %v807_v33 = vmul.f32 %v3427_v32, %v3425_v26 }
 0x702   :  { %3305 = vmatmul.mubr.msk.f32.vlgmr.msra.gmra.mrb[10].mxu1 %vm300_vm2, %v807_v33 }
 0x703   :  { %3318 = vmatpush3.xpose.msk.msra.mxu1 %vm300_vm2, %v1125_v30  ;;  %3319 = vmatprep.mubr.msk.f32.mxu1 %vm3696_vm1, %v3695_v36 }
 0x704   :  { %3322 = vmatprep.subr.mxu1 %v3695_v36 }
 0x706   :  { %3320 = vmatmul.mubr.msk.f32.vlgmr.msra.gmra.mrb[12].mxu1 %vm300_vm2, %v1123_v34 }
 0x707   :  { %3323 = vmatpush3.xpose.msk.msra.mxu1 %vm300_vm2, %v1203_v35  ;;  %3324 = vmatprep.mubr.msk.f32.mxu1 %vm3696_vm1, %v3695_v36 }
 0x708   :  { %3332 = vmatprep.subr.mxu1 %v3695_v36 }
 0x70a   :  { %3325 = vmatmul.mubr.msk.f32.vlgmr.msra.gmra.mrb[14].mxu1 %vm300_vm2, %v1201_v37 }
 0x70b   :  { %3334 = vmatprep.mubr.msk.f32.mxu1 %vm3696_vm1, %v3695_v36 }
 0x729   :  { %v788_v38 = vpop.xlane.xlu1 %787 }
 0x72a   :  { %v792_v40 = vsub.f32 %v784_v28, %v788_v38 }
 0x72c   :  { %v794_v42 = vmul.f32 1.442695, %v792_v40 }
 0x72e   :  { %3428 = vpow2.f32 %v794_v42 }
 0x738   :  { %v3429_v43 = vpop.eup %3428 }
 0x739   :  { %v798_v44 = vsel %vm300_vm2, %v3429_v43, 0.0 }
 0x73a   :  { %799 = vadd.xlane.f32.xlu0 %v798_v44 }
 0x750   :  { %808 = vrot.lane.b32.xlu0 %v3874_v41, %s3701_s15 }
 0x754   :  { %1378 = vrot.lane.b32.xlu0 %v3872_v39, %s3703_s23 }
 0x758   :  { %1539 = vrot.lane.b32.xlu0 %v3874_v41, %s3704_s24 }
 0x75c   :  { %1617 = vrot.lane.b32.xlu0 %v3872_v39, %s3704_s24 }
 0x760   :  { %1537 = vrot.lane.b32.xlu0 %v3874_v41, %s3705_s25 }
 0x7c7   :  { %v800_v45 = vpop.xlane.xlu0 %799 }
 0x7c8   :  { %3430 = vrcp.f32 %v800_v45 }
 0x7cb   :  { %v809_v46 = vpop.permute.xlu0 %808 }
 0x7cc   :  { %3298 = vmatpush3.msra.mxu0 %v809_v46 }
 0x7cd   :  { %3307 = vmatprep.subr.mxu0 %v294_v60 }
 0x7cf   :  { %v1379_v47 = vpop.permute.xlu0 %1378 }
 0x7d0   :  { %3333 = vmatpush3.msra.mxu1 %v1379_v47 }
 0x7d1   :  { %3342 = vmatprep.subr.mxu1 %v3695_v36 }
 0x7d2   :  { %v3431_v48 = vpop.eup %3430 }
 0x7d3   :  { %v806_v49 = vmul.f32 %v3431_v48, %v3429_v43  ;;  %v1540_v18 = vpop.permute.xlu0 %1539 }
 0x7d5   :  { %3300 = vmatmul.mubr.msk.f32.vlgmr.msra.gmra.mrb[4].mxu0 %vm300_vm2, %v806_v49  ;;  %v956_v50 = vpop.f32.mrb[10].mxu1 }
 0x7d6   :  { %v3306_v51 = vpop.f32.mrb[11].mxu1  ;;  %3308 = vmatpush3.msra.mxu0 %v294_v60 }
 0x7d7   :  { %3312 = vmatprep.subr.mxu0 %v293_v61  ;;  %v1618_v21 = vpop.permute.xlu0 %1617 }
 0x7d9   :  { %v1196_v52 = vpop.f32.mrb[12].mxu1 }
 0x7da   :  { %v1278_v53 = vmul.f32 0.17677669, %v1196_v52  ;;  %v3321_v54 = vpop.f32.mrb[13].mxu1 }
 0x7db   :  { %v1538_v22 = vpop.permute.xlu0 %1537 }
 0x7dc   :  { %v1280_v55 = vsel %vm300_vm2, %v1278_v53, -inf }
 0x7dd   :  { %1281 = vmax.xlane.f32.xlu1 %v1280_v55  ;;  %v1274_v56 = vpop.f32.mrb[14].mxu1  ;;  %v296_v55 = vld [vmem:[#allocation10 + $0x18] sm:$0xff] }
 0x7de   :  { %v1279_v57 = vmul.f32 0.17677669, %v1274_v56  ;;  %v3326_v58 = vpop.f32.mrb[15].mxu1 }
 0x7e0   :  { %v1283_v59 = vsel %vm300_vm2, %v1279_v57, -inf }
 0x7e1   :  { %1284 = vmax.xlane.f32.xlu1 %v1283_v59  ;;  %v3160_v59 = vld [vmem:[%s4307_s6] ss:$0 sm:$0xff] }
 0x86a   :  { %v1282_v62 = vpop.xlane.xlu1 %1281 }
 0x86b   :  { %v1286_v63 = vsub.f32 %v1278_v53, %v1282_v62 }
 0x86d   :  { %v1288_v2 = vmul.f32 1.442695, %v1286_v63 }
 0x86e   :  { %v1285_v3 = vpop.xlane.xlu1 %1284 }
 0x86f   :  { %3432 = vpow2.f32 %v1288_v2  ;;  %v1287_v4 = vsub.f32 %v1279_v57, %v1285_v3 }
 0x871   :  { %v1290_v5 = vmul.f32 1.442695, %v1287_v4 }
 0x873   :  { %3434 = vpow2.f32 %v1290_v5 }
 0x879   :  { %v3433_v6 = vpop.eup %3432 }
 0x87a   :  { %v1292_v7 = vsel %vm300_vm2, %v3433_v6, 0.0 }
 0x87b   :  { %1293 = vadd.xlane.f32.xlu1 %v1292_v7 }
 0x87d   :  { %v3435_v8 = vpop.eup %3434 }
 0x87e   :  { %v1295_v9 = vsel %vm300_vm2, %v3435_v8, 0.0 }
 0x87f   :  { %1296 = vadd.xlane.f32.xlu1 %v1295_v9 }
 0x890   :  { %1302 = vrot.lane.b32.xlu1 %v3874_v41, %s3703_s23 }
 0x894   :  { %1615 = vrot.lane.b32.xlu1 %v3872_v39, %s3705_s25 }
 0x8a8   :  { %v880_v10 = vpop.f32.mrb[4].mxu0 }
 0x8a9   :  { %v3301_v11 = vpop.f32.mrb[5].mxu0  ;;  %3309 = vmatprep.mubr.msk.f32.mxu0 %vm300_vm2, %v880_v10 }
 0x8aa   :  { %3310 = vmatmul.mubr.msk.f32.vlgmr.msra.gmra.mrb[6].mxu0 %vm300_vm2, %v956_v50 }
 0x8ab   :  { %3314 = vmatprep.mubr.msk.f32.mxu0 %vm300_vm2, %v3922_v13  ;;  %3313 = vmatpush3.msra.mxu0 %v293_v61 }
 0x8ac   :  { %3327 = vmatprep.subr.mxu0 %v3695_v36 }
 0x8b2   :  { %3315 = vmatmul.mubr.msk.f32.vlgmr.msra.gmra.mrb[6].mxu0 %vm300_vm2, %v3924_v16 }
 0x8b3   :  { %3329 = vmatprep.mubr.msk.f32.mxu0 %vm3696_vm1, %v3695_v36 }
 0x908   :  { %v1294_v12 = vpop.xlane.xlu1 %1293 }
 0x909   :  { %3436 = vrcp.f32 %v1294_v12 }
 0x90c   :  { %v1297_v14 = vpop.xlane.xlu1 %1296 }
 0x90d   :  { %3438 = vrcp.f32 %v1297_v14 }
 0x910   :  { %v1303_v17 = vpop.permute.xlu1 %1302 }
 0x911   :  { %3328 = vmatpush3.msra.mxu0 %v1303_v17 }
 0x912   :  { %3337 = vmatprep.subr.mxu0 %v295_v15 }
 0x913   :  { %v3437_v19 = vpop.eup %3436 }
 0x914   :  { %v1300_v13 = vmul.f32 %v3437_v19, %v3433_v6  ;;  %v1616_v27 = vpop.permute.xlu1 %1615 }
 0x916   :  { %3330 = vmatmul.mubr.msk.f32.vlgmr.msra.gmra.mrb[8].mxu0 %vm300_vm2, %v1300_v13 }
 0x917   :  { %v3439_v20 = vpop.eup %3438  ;;  %3338 = vmatpush3.msra.mxu0 %v295_v15 }
 0x918   :  { %v1301_v16 = vmul.f32 %v3439_v20, %v3435_v8  ;;  %3347 = vmatprep.subr.mxu0 %v3695_v36 }
 0x91a   :  { %3335 = vmatmul.mubr.msk.f32.vlgmr.msra.gmra.mrb[16].mxu1 %vm300_vm2, %v1301_v16  ;;  %v3161_v16 = vld [vmem:[%s4308_s7] ss:$0 sm:$0xff] }
 0x91b   :  { %3343 = vmatpush3.xpose.msk.msra.mxu1 %vm300_vm2, %v1540_v18  ;;  %3344 = vmatprep.mubr.msk.f32.mxu1 %vm3696_vm1, %v3695_v36 }
 0x91c   :  { %3352 = vmatprep.subr.mxu1 %v3695_v36 }
 0x91e   :  { %3345 = vmatmul.mubr.msk.f32.vlgmr.msra.gmra.mrb[18].mxu1 %vm300_vm2, %v1538_v22 }
 0x91f   :  { %3354 = vmatprep.mubr.msk.f32.mxu1 %vm3696_vm1, %v3695_v36 }
 0x9e9   :  { %v1374_v23 = vpop.f32.mrb[8].mxu0 }
 0x9ea   :  { %v3331_v24 = vpop.f32.mrb[9].mxu0  ;;  %3339 = vmatprep.mubr.msk.f32.mxu0 %vm300_vm2, %v1374_v23 }
 0x9eb   :  { %v3162_v24 = vld [vmem:[%s4309_s8] ss:$0 sm:$0xff] }
 0x9ed   :  { %v1450_v25 = vpop.f32.mrb[16].mxu1 }
 0x9ee   :  { %v3336_v26 = vpop.f32.mrb[17].mxu1  ;;  %3340 = vmatmul.mubr.msk.f32.vlgmr.msra.gmra.mrb[6].mxu0 %vm300_vm2, %v1450_v25 }
 0x9ef   :  { %3348 = vmatpush3.xpose.msk.msra.mxu0 %vm300_vm2, %v1618_v21  ;;  %3349 = vmatprep.mubr.msk.f32.mxu0 %vm3696_vm1, %v3695_v36 }
 0x9f0   :  { %3357 = vmatprep.subr.mxu0 %v3695_v36 }
 0x9f1   :  { %v1611_v28 = vpop.f32.mrb[18].mxu1 }
 0x9f2   :  { %v1693_v29 = vmul.f32 0.17677669, %v1611_v28  ;;  %v3346_v30 = vpop.f32.mrb[19].mxu1  ;;  %3350 = vmatmul.mubr.msk.f32.vlgmr.msra.gmra.mrb[10].mxu0 %vm300_vm2, %v1616_v27 }
 0x9f3   :  { %3359 = vmatprep.mubr.msk.f32.mxu0 %vm3696_vm1, %v3695_v36 }
 0x9f4   :  { %v1695_v31 = vsel %vm300_vm2, %v1693_v29, -inf }
 0x9f5   :  { %1696 = vmax.xlane.f32.xlu0 %v1695_v31 }
 0xa82   :  { %v1697_v32 = vpop.xlane.xlu0 %1696 }
 0xa83   :  { %v1701_v33 = vsub.f32 %v1693_v29, %v1697_v32 }
 0xa85   :  { %v1703_v34 = vmul.f32 1.442695, %v1701_v33 }
 0xa87   :  { %3440 = vpow2.f32 %v1703_v34 }
 0xa91   :  { %v3441_v35 = vpop.eup %3440 }
 0xa92   :  { %v1707_v37 = vsel %vm300_vm2, %v3441_v35, 0.0 }
 0xa93   :  { %1708 = vadd.xlane.f32.xlu0 %v1707_v37 }
 0xac5   :  { %v1689_v38 = vpop.f32.mrb[10].mxu0 }
 0xac6   :  { %v1694_v40 = vmul.f32 0.17677669, %v1689_v38  ;;  %v3351_v42 = vpop.f32.mrb[11].mxu0 }
 0xac8   :  { %v1698_v43 = vsel %vm300_vm2, %v1694_v40, -inf }
 0xac9   :  { %1699 = vmax.xlane.f32.xlu1 %v1698_v43 }
 0xada   :  { %1793 = vrot.lane.b32.xlu1 %v3872_v39, %s3706_s27 }
 0xb20   :  { %v1709_v49 = vpop.xlane.xlu0 %1708 }
 0xb56   :  { %v1700_v36 = vpop.xlane.xlu1 %1699 }
 0xb57   :  { %v1702_v44 = vsub.f32 %v1694_v40, %v1700_v36 }
 0xb59   :  { %v1705_v45 = vmul.f32 1.442695, %v1702_v44 }
 0xb5a   :  { %v1794_v46 = vpop.permute.xlu1 %1793 }
 0xb5b   :  { %3442 = vpow2.f32 %v1705_v45  ;;  %3358 = vmatpush3.msra.mxu0 %v1794_v46 }
 0xb5c   :  { %3444 = vrcp.f32 %v1709_v49  ;;  %3362 = vmatprep.subr.mxu0 %v296_v55 }
 0xb65   :  { %v3443_v47 = vpop.eup %3442 }
 0xb66   :  { %v1710_v48 = vsel %vm300_vm2, %v3443_v47, 0.0  ;;  %v3445_v51 = vpop.eup %3444 }
 0xb67   :  { %1711 = vadd.xlane.f32.xlu0 %v1710_v48  ;;  %v1715_v52 = vmul.f32 %v3445_v51, %v3441_v35 }
 0xb7d   :  { %1717 = vrot.lane.b32.xlu0 %v3874_v41, %s3706_s27 }
 0xbf4   :  { %v1712_v50 = vpop.xlane.xlu0 %1711 }
 0xbf5   :  { %3446 = vrcp.f32 %v1712_v50 }
 0xbf8   :  { %v1718_v53 = vpop.permute.xlu0 %1717 }
 0xbf9   :  { %3353 = vmatpush3.msra.mxu1 %v1718_v53 }
 0xbfa   :  { %3355 = vmatmul.mubr.msk.f32.vlgmr.msra.gmra.mrb[20].mxu1 %vm300_vm2, %v1715_v52 }
 0xbff   :  { %v3447_v39 = vpop.eup %3446 }
 0xc00   :  { %v1716_v54 = vmul.f32 %v3447_v39, %v3443_v47 }
 0xc02   :  { %3360 = vmatmul.mubr.msk.f32.vlgmr.msra.gmra.mrb[12].mxu0 %vm300_vm2, %v1716_v54 }
 0xc03   :  { %3363 = vmatpush3.msra.mxu0 %v296_v55 }
 0xccd   :  { %v1789_v56 = vpop.f32.mrb[20].mxu1 }
 0xcce   :  { %v3356_v57 = vpop.f32.mrb[21].mxu1  ;;  %3364 = vmatprep.mubr.msk.f32.mxu0 %vm300_vm2, %v1789_v56 }
 0xcd5   :  { %v1865_v41 = vpop.f32.mrb[12].mxu0 }
 0xcd6   :  { %v3361_v58 = vpop.f32.mrb[13].mxu0  ;;  %3365 = vmatmul.mubr.msk.f32.vlgmr.msra.gmra.mrb[6].mxu0 %vm300_vm2, %v1865_v41 }
 0xda9   :  { %v3366_v60 = vpop.f32.mrb[6].mxu0 }
 0xdaa   :  { %v1960_v61 = vadd.f32 %v3366_v60, %v3160_v59  ;;  %v1941_v62 = vpop.f32.mrb[7].mxu0 }
 0xdab   :  { %v1959_v63 = vadd.f32 %v3160_v59, %v1941_v62 }
 0xdac   :  { %v4010_v2 = vadd.f32 %v1960_v61, %v3845_v1 }
 0xdad   :  { %v4013_v3 = vadd.f32 %v1959_v63, %v3843_v0 }
 0xdae   :  { %v1968_v4 = vsel %vm157_vm0, %v4010_v2, 0.0 }
 0xdaf   :  { %1969 = vadd.xlane.f32.xlu0 %v1968_v4  ;;  %v1965_v5 = vsel %vm157_vm0, %v4013_v3, 0.0 }
 0xdb0   :  { %1966 = vadd.xlane.f32.xlu1 %v1965_v5 }
 0xe3c   :  { %v1970_v6 = vpop.xlane.xlu0 %1969 }
 0xe3d   :  { %v1972_v7 = vmul.f32 0.03125, %v1970_v6  ;;  %v1967_v8 = vpop.xlane.xlu1 %1966 }
 0xe3e   :  { %v1971_v9 = vmul.f32 0.03125, %v1967_v8 }
 0xe3f   :  { %v1974_v10 = vsub.f32 %v4010_v2, %v1972_v7 }
 0xe40   :  { %v1973_v1 = vsub.f32 %v4013_v3, %v1971_v9 }
 0xe41   :  { %v1976_v11 = vmul.f32 %v1974_v10, %v1974_v10 }
 0xe42   :  { %v1975_v12 = vmul.f32 %v1973_v1, %v1973_v1 }
 0xe43   :  { %v1980_v0 = vsel %vm157_vm0, %v1976_v11, 0.0 }
 0xe44   :  { %1981 = vadd.xlane.f32.xlu1 %v1980_v0  ;;  %v1977_v14 = vsel %vm157_vm0, %v1975_v12, 0.0 }
 0xe45   :  { %1978 = vadd.xlane.f32.xlu0 %v1977_v14 }
 0xed1   :  { %v1982_v15 = vpop.xlane.xlu1 %1981 }
 0xed2   :  { %v1984_v17 = vmul.f32 0.03125, %v1982_v15  ;;  %v1979_v18 = vpop.xlane.xlu0 %1978 }
 0xed3   :  { %v1983_v19 = vmul.f32 0.03125, %v1979_v18 }
 0xed4   :  { %v1986_v13 = vadd.f32 1e-05, %v1984_v17 }
 0xed5   :  { %v1985_v20 = vadd.f32 1e-05, %v1983_v19 }
 0xed6   :  { %3448 = vrsqrt.f32 %v1986_v13 }
 0xed7   :  { %3450 = vrsqrt.f32 %v1985_v20 }
 0xee0   :  { %v3449_v21 = vpop.eup %3448 }
 0xee1   :  { %v3451_v22 = vpop.eup %3450  ;;  %v1990_v23 = vmul.f32 %v3449_v21, %v1974_v10 }
 0xee2   :  { %v1989_v25 = vmul.f32 %v3451_v22, %v1973_v1 }
 0xee3   :  { %v1998_v26 = vmul.f32 %v3161_v16, %v1990_v23 }
 0xee4   :  { %v1997_v27 = vmul.f32 %v3161_v16, %v1989_v25 }
 0xee5   :  { %v2006_v28 = vadd.f32 %v3162_v24, %v1998_v26 }
 0xee6   :  { %v2005_v29 = vadd.f32 %v3162_v24, %v1997_v27 }
 0xee7   :  { %3672 = dma.done.wait [#allocation4], 4096 }
 0xee8   :  { %3673 = vsyncadd [#allocation4], 4294963200 }
 0xee9   :  { %3674 = dma.done.wait [#allocation4 + $0x1], 4096 }
 0xeea   :  { %3675 = vsyncadd [#allocation4 + $0x1], 4294963200  ;;  %v3707_v30 = vmov 0   ;;  %v2015_v31 = vld [vmem:[#allocation2 + $0x8] sm:$0xff]  ;;  %v2017_v32 = vld [vmem:[#allocation2 + $0x18] sm:$0xff]  ;;  %v2013_v36 = vpack.c.bf16 %v2006_v28, %v2005_v29  ;;  %v2050_v0 = vlaneseq }
 0xeeb   :  { %2165 = vmatprep.mubr.bf16.mxu1 %v3707_v30  ;;  %2208 = vmatprep.mubr.bf16.mxu0 %v3707_v30  ;;  %v2014_v33 = vld [vmem:[#allocation2] sm:$0xff]  ;;  %v2016_v34 = vld [vmem:[#allocation2 + $0x10] sm:$0xff]  ;;  %v2031_v35 = vld [vmem:[#allocation2 + $0x88] sm:$0xff] }
 0xeec   :  { %2133 = vmatprep.subr.bf16.mxu1 %v2015_v31  ;;  %2176 = vmatprep.subr.bf16.mxu0 %v2017_v32  ;;  %v2033_v37 = vld [vmem:[#allocation2 + $0x98] sm:$0xff]  ;;  %v2030_v38 = vld [vmem:[#allocation2 + $0x80] sm:$0xff]  ;;  %v2032_v40 = vld [vmem:[#allocation2 + $0x90] sm:$0xff]  ;;  %v4045_v14 = vshrl.u32 %v2050_v0, 7 }
 0xeed   :  { %2134 = vmatpush1.bf16.msra.mxu1 %v2014_v33  ;;  %2177 = vmatpush1.bf16.msra.mxu0 %v2016_v34  ;;  %v2019_v42 = vld [vmem:[#allocation2 + $0x28] sm:$0xff]  ;;  %v2021_v43 = vld [vmem:[#allocation2 + $0x38] sm:$0xff]  ;;  %v2018_v44 = vld [vmem:[#allocation2 + $0x20] sm:$0xff] }
 0xeee   :  { %2135 = vmatprep.subr.bf16.mxu1 %v2031_v35  ;;  %2178 = vmatprep.subr.bf16.mxu0 %v2033_v37  ;;  %v2020_v45 = vld [vmem:[#allocation2 + $0x30] sm:$0xff]  ;;  %v2035_v46 = vld [vmem:[#allocation2 + $0xa8] sm:$0xff]  ;;  %v2037_v47 = vld [vmem:[#allocation2 + $0xb8] sm:$0xff]  ;;  %v2052_v15 = vsub.s32 0, %v4045_v14  ;;  %v2060_v17 = vsub.s32 2, %v4045_v14  ;;  %v2056_v19 = vsub.s32 1, %v4045_v14 }
 0xeef   :  { %v2034_v48 = vld [vmem:[#allocation2 + $0xa0] sm:$0xff]  ;;  %v2036_v49 = vld [vmem:[#allocation2 + $0xb0] sm:$0xff]  ;;  %v2023_v50 = vld [vmem:[#allocation2 + $0x48] sm:$0xff]  ;;  %v2064_v13 = vsub.s32 3, %v4045_v14  ;;  %v2068_v29 = vsub.s32 4, %v4045_v14  ;;  %v2072_v35 = vsub.s32 5, %v4045_v14 }
 0xef0   :  { %v2025_v51 = vld [vmem:[#allocation2 + $0x58] sm:$0xff]  ;;  %v2022_v52 = vld [vmem:[#allocation2 + $0x40] sm:$0xff]  ;;  %v2024_v53 = vld [vmem:[#allocation2 + $0x50] sm:$0xff]  ;;  %v2080_v37 = vsub.s32 7, %v4045_v14 }
 0xef1   :  { %2136 = vmatpush1.bf16.msra.mxu1 %v2030_v38  ;;  %2179 = vmatpush1.bf16.msra.mxu0 %v2032_v40  ;;  %v2039_v39 = vld [vmem:[#allocation2 + $0xc8] sm:$0xff]  ;;  %v2041_v54 = vld [vmem:[#allocation2 + $0xd8] sm:$0xff]  ;;  %v2038_v55 = vld [vmem:[#allocation2 + $0xc0] sm:$0xff] }
 0xef2   :  { %2219 = vmatprep.subr.bf16.mxu1 %v2019_v42  ;;  %2262 = vmatprep.subr.bf16.mxu0 %v2021_v43  ;;  %v2040_v56 = vld [vmem:[#allocation2 + $0xd0] sm:$0xff]  ;;  %v2027_v57 = vld [vmem:[#allocation2 + $0x68] sm:$0xff]  ;;  %v2029_v41 = vld [vmem:[#allocation2 + $0x78] sm:$0xff] }
 0xef3   :  { %v2026_v58 = vld [vmem:[#allocation2 + $0x60] sm:$0xff]  ;;  %v2028_v59 = vld [vmem:[#allocation2 + $0x70] sm:$0xff]  ;;  %v2043_v60 = vld [vmem:[#allocation2 + $0xe8] sm:$0xff] }
 0xef4   :  { %3163 = vmatmul.mubr.msk.bf16.vlgmr.msra.gmra.mrb[24].mxu1 %vm157_vm0, %v2013_v36  ;;  %3164 = vmatmul.mubr.msk.bf16.vlgmr.msra.gmra.mrb[16].mxu0 %vm157_vm0, %v2013_v36  ;;  %v2045_v61 = vld [vmem:[#allocation2 + $0xf8] sm:$0xff]  ;;  %v2042_v62 = vld [vmem:[#allocation2 + $0xe0] sm:$0xff]  ;;  %v2044_v63 = vld [vmem:[#allocation2 + $0xf0] sm:$0xff] }
 0xef5   :  { %2220 = vmatpush1.bf16.msra.mxu1 %v2018_v44  ;;  %2263 = vmatpush1.bf16.msra.mxu0 %v2020_v45  ;;  %v2718_v4 = vld [vmem:[#allocation3 + $0x8] sm:$0xff]  ;;  %v2720_v5 = vld [vmem:[#allocation3 + $0x18] sm:$0xff]  ;;  %v2717_v6 = vld [vmem:[#allocation3] sm:$0xff] }
 0xef6   :  { %2221 = vmatprep.subr.bf16.mxu1 %v2035_v46  ;;  %2264 = vmatprep.subr.bf16.mxu0 %v2037_v47  ;;  %v2719_v7 = vld [vmem:[#allocation3 + $0x10] sm:$0xff]  ;;  %v2734_v8 = vld [vmem:[#allocation3 + $0x88] sm:$0xff]  ;;  %v2736_v9 = vld [vmem:[#allocation3 + $0x98] sm:$0xff] }
 0xef7   :  { %2251 = vmatprep.mubr.bf16.mxu1 %v3707_v30  ;;  %2294 = vmatprep.mubr.bf16.mxu0 %v3707_v30  ;;  %v2733_v10 = vld [vmem:[#allocation3 + $0x80] sm:$0xff]  ;;  %v2735_v1 = vld [vmem:[#allocation3 + $0x90] sm:$0xff]  ;;  %v2722_v11 = vld [vmem:[#allocation3 + $0x28] sm:$0xff] }
 0xef8   :  { %v2724_v12 = vld [vmem:[#allocation3 + $0x38] sm:$0xff]  ;;  %v2046_v18 = vld [vmem:[%s4311_s10] sm:$0xff] }
 0xef9   :  { %2222 = vmatpush1.bf16.msra.mxu1 %v2034_v48  ;;  %2265 = vmatpush1.bf16.msra.mxu0 %v2036_v49  ;;  %v2053_v20 = vrot.slane %v2046_v18, %v2052_v15  ;;  %v2061_v21 = vrot.slane %v2046_v18, %v2060_v17  ;;  %v2057_v16 = vrot.slane %v2046_v18, %v2056_v19 }
 0xefa   :  { %2305 = vmatprep.subr.bf16.mxu1 %v2023_v50  ;;  %2348 = vmatprep.subr.bf16.mxu0 %v2025_v51  ;;  %v2065_v22 = vrot.slane %v2046_v18, %v2064_v13  ;;  %v2069_v50 = vrot.slane %v2046_v18, %v2068_v29 }
 0xefc   :  { %3165 = vmatmul.mubr.msk.bf16.vlgmr.msra.gmra.mrb[28].mxu1 %vm157_vm0, %v2013_v36  ;;  %3166 = vmatmul.mubr.msk.bf16.vlgmr.msra.gmra.mrb[20].mxu0 %vm157_vm0, %v2013_v36 }
 0xefd   :  { %2306 = vmatpush1.bf16.msra.mxu1 %v2022_v52  ;;  %2349 = vmatpush1.bf16.msra.mxu0 %v2024_v53  ;;  %v2073_v53 = vrot.slane %v2046_v18, %v2072_v35 }
 0xefe   :  { %2307 = vmatprep.subr.bf16.mxu1 %v2039_v39  ;;  %2350 = vmatprep.subr.bf16.mxu0 %v2041_v54  ;;  %v4096_v39 = vrot.slane %v2046_v18, %v2080_v37 }
 0xeff   :  { %2337 = vmatprep.mubr.bf16.mxu1 %v3707_v30  ;;  %2380 = vmatprep.mubr.bf16.mxu0 %v3707_v30 }
 0xf01   :  { %2308 = vmatpush1.bf16.msra.mxu1 %v2038_v55  ;;  %2351 = vmatpush1.bf16.msra.mxu0 %v2040_v56 }
 0xf02   :  { %2391 = vmatprep.subr.bf16.mxu1 %v2027_v57  ;;  %2434 = vmatprep.subr.bf16.mxu0 %v2029_v41 }
 0xf04   :  { %3167 = vmatmul.mubr.msk.bf16.vlgmr.msra.gmra.mrb[32].mxu1 %vm157_vm0, %v2013_v36  ;;  %3168 = vmatmul.mubr.msk.bf16.vlgmr.msra.gmra.mrb[24].mxu0 %vm157_vm0, %v2013_v36 }
 0xf05   :  { %2392 = vmatpush1.bf16.msra.mxu1 %v2026_v58  ;;  %2435 = vmatpush1.bf16.msra.mxu0 %v2028_v59 }
 0xf06   :  { %2393 = vmatprep.subr.bf16.mxu1 %v2043_v60  ;;  %2436 = vmatprep.subr.bf16.mxu0 %v2045_v61 }
 0xf07   :  { %2423 = vmatprep.mubr.bf16.mxu1 %v3707_v30  ;;  %2466 = vmatprep.mubr.bf16.mxu0 %v3707_v30  ;;  %v2076_v30 = vsub.s32 6, %v4045_v14 }
 0xf09   :  { %2394 = vmatpush1.bf16.msra.mxu1 %v2042_v62  ;;  %2437 = vmatpush1.bf16.msra.mxu0 %v2044_v63  ;;  %v2077_v51 = vrot.slane %v2046_v18, %v2076_v30 }
 0xf0a   :  { %2756 = vmatprep.subr.bf16.mxu1 %v2718_v4  ;;  %2797 = vmatprep.subr.bf16.mxu0 %v2720_v5 }
 0xf0c   :  { %3169 = vmatmul.mubr.msk.bf16.vlgmr.msra.gmra.mrb[36].mxu1 %vm157_vm0, %v2013_v36  ;;  %3170 = vmatmul.mubr.msk.bf16.vlgmr.msra.gmra.mrb[28].mxu0 %vm157_vm0, %v2013_v36 }
 0xf12   :  { %2757 = vmatpush1.bf16.xpose.msra.mxu1 %v2717_v6  ;;  %2798 = vmatpush1.bf16.xpose.msra.mxu0 %v2719_v7 }
 0xf13   :  { %2758 = vmatprep.subr.bf16.mxu1 %v2734_v8  ;;  %2799 = vmatprep.subr.bf16.mxu0 %v2736_v9 }
 0xf1a   :  { %2759 = vmatpush1.bf16.xpose.msra.mxu1 %v2733_v10  ;;  %2800 = vmatpush1.bf16.xpose.msra.mxu0 %v2735_v1 }
 0xf1b   :  { %2838 = vmatprep.subr.bf16.mxu1 %v2722_v11  ;;  %2879 = vmatprep.subr.bf16.mxu0 %v2724_v12 }
 0xfc7   :  { %v2167_v23 = vpop.f32.mrb[24].mxu1  ;;  %v2210_v24 = vpop.f32.mrb[16].mxu0 }
 0xfc8   :  { %v4062_v25 = vadd.f32 %v2167_v23, %v2053_v20  ;;  %v4064_v26 = vadd.f32 %v2210_v24, %v2061_v21  ;;  %v2169_v27 = vpop.f32.mrb[25].mxu1  ;;  %v2212_v28 = vpop.f32.mrb[17].mxu0 }
 0xfc9   :  { %v4068_v31 = vadd.f32 %v2169_v27, %v2057_v16  ;;  %v4070_v32 = vadd.f32 %v2212_v28, %v2065_v22  ;;  %v2171_v33 = vpop.f32.mrb[26].mxu1  ;;  %v2214_v34 = vpop.f32.mrb[18].mxu0 }
 0xfca   :  { %v3171_v38 = vmul.f32 -1.442695, %v4062_v25  ;;  %v3173_v40 = vmul.f32 -1.442695, %v4064_v26  ;;  %v4076_v42 = vadd.f32 %v2171_v33, %v2053_v20  ;;  %v4078_v43 = vadd.f32 %v2214_v34, %v2061_v21  ;;  %v2173_v36 = vpop.f32.mrb[27].mxu1  ;;  %v2216_v44 = vpop.f32.mrb[19].mxu0 }
 0xfcb   :  { %v3172_v45 = vmul.f32 -1.442695, %v4068_v31  ;;  %v3174_v46 = vmul.f32 -1.442695, %v4070_v32  ;;  %v4082_v47 = vadd.f32 %v2173_v36, %v2057_v16  ;;  %v4084_v48 = vadd.f32 %v2216_v44, %v2065_v22  ;;  %v4119_v33 = vld [vmem:[%s4311_s10 + $0x8] sm:$0xff] }
 0xfcc   :  { %3452 = vpow2.f32 %v3171_v38  ;;  %v3187_v49 = vmul.f32 -1.442695, %v4076_v42  ;;  %v3189_v52 = vmul.f32 -1.442695, %v4078_v43 }
 0xfcd   :  { %3454 = vpow2.f32 %v3173_v40  ;;  %v3188_v54 = vmul.f32 -1.442695, %v4082_v47  ;;  %v3190_v55 = vmul.f32 -1.442695, %v4084_v48 }
 0xfce   :  { %3456 = vpow2.f32 %v3172_v45 }
 0xfcf   :  { %3458 = vpow2.f32 %v3174_v46  ;;  %v2253_v56 = vpop.f32.mrb[28].mxu1  ;;  %v2296_v57 = vpop.f32.mrb[20].mxu0 }
 0xfd0   :  { %3460 = vpow2.f32 %v3187_v49  ;;  %v4100_v41 = vadd.f32 %v2253_v56, %v2069_v50  ;;  %v4102_v58 = vadd.f32 %v2296_v57, %v2077_v51  ;;  %v2255_v59 = vpop.f32.mrb[29].mxu1  ;;  %v2298_v60 = vpop.f32.mrb[21].mxu0  ;;  %v2085_v56 = vrot.slane %v4119_v33, %v2052_v15 }
 0xfd1   :  { %3462 = vpow2.f32 %v3189_v52  ;;  %v4104_v61 = vadd.f32 %v2255_v59, %v2073_v53  ;;  %v4107_v62 = vadd.f32 %v2298_v60, %v4096_v39  ;;  %v2257_v63 = vpop.f32.mrb[30].mxu1  ;;  %v2300_v4 = vpop.f32.mrb[22].mxu0  ;;  %v2093_v60 = vrot.slane %v4119_v33, %v2060_v17 }
 0xfd2   :  { %3464 = vpow2.f32 %v3188_v54  ;;  %v3175_v5 = vmul.f32 -1.442695, %v4100_v41  ;;  %v3177_v6 = vmul.f32 -1.442695, %v4102_v58  ;;  %v4111_v7 = vadd.f32 %v2257_v63, %v2069_v50  ;;  %v2259_v8 = vpop.f32.mrb[31].mxu1  ;;  %v2302_v9 = vpop.f32.mrb[23].mxu0 }
 0xfd3   :  { %3466 = vpow2.f32 %v3190_v55  ;;  %v3176_v10 = vmul.f32 -1.442695, %v4104_v61  ;;  %v3178_v1 = vmul.f32 -1.442695, %v4107_v62  ;;  %v4121_v49 = vadd.f32 %v2300_v4, %v2077_v51 }
 0xfd4   :  { %3468 = vpow2.f32 %v3175_v5  ;;  %v3191_v11 = vmul.f32 -1.442695, %v4111_v7  ;;  %v4123_v55 = vadd.f32 %v2259_v8, %v2073_v53  ;;  %v2089_v51 = vrot.slane %v4119_v33, %v2056_v19 }
 0xfd5   :  { %3470 = vpow2.f32 %v3177_v6  ;;  %v2097_v53 = vrot.slane %v4119_v33, %v2064_v13  ;;  %v3193_v6 = vmul.f32 -1.442695, %v4121_v49  ;;  %v4139_v8 = vadd.f32 %v2302_v9, %v4096_v39 }
 0xfd6   :  { %v3453_v12 = vpop.eup %3452  ;;  %3472 = vpow2.f32 %v3176_v10  ;;  %v3192_v19 = vmul.f32 -1.442695, %v4123_v55 }
 0xfd7   :  { %v3455_v0 = vpop.eup %3454  ;;  %v2573_v18 = vadd.f32 1.0, %v3453_v12  ;;  %3474 = vpow2.f32 %v3178_v1  ;;  %v2339_v20 = vpop.f32.mrb[32].mxu1 }
 0xfd8   :  { %v2382_v21 = vpop.f32.mrb[24].mxu0  ;;  %v3457_v16 = vpop.eup %3456  ;;  %v2575_v22 = vadd.f32 1.0, %v3455_v0  ;;  %3476 = vpow2.f32 %v3191_v11  ;;  %v4142_v11 = vadd.f32 %v2339_v20, %v2085_v56 }
 0xfd9   :  { %v2341_v23 = vpop.f32.mrb[33].mxu1  ;;  %v2384_v24 = vpop.f32.mrb[25].mxu0  ;;  %3478 = vrcp.f32 %v2573_v18  ;;  %v2574_v28 = vadd.f32 1.0, %v3457_v16  ;;  %v4146_v16 = vadd.f32 %v2382_v21, %v2093_v60 }
 0xfda   :  { %v3459_v27 = vpop.eup %3458  ;;  %v2343_v34 = vpop.f32.mrb[34].mxu1  ;;  %3480 = vrcp.f32 %v2575_v22  ;;  %v4148_v22 = vadd.f32 %v2341_v23, %v2089_v51 }
 0xfdb   :  { %v2386_v38 = vpop.f32.mrb[26].mxu0  ;;  %v3461_v40 = vpop.eup %3460  ;;  %v2576_v36 = vadd.f32 1.0, %v3459_v27  ;;  %3482 = vrcp.f32 %v2574_v28  ;;  %v4156_v20 = vadd.f32 %v2343_v34, %v2085_v56  ;;  %v4172_v34 = vrot.slane %v4119_v33, %v2068_v29 }
 0xfdc   :  { %v2345_v44 = vpop.f32.mrb[35].mxu1  ;;  %v3463_v45 = vpop.eup %3462  ;;  %v2589_v46 = vadd.f32 1.0, %v3461_v40  ;;  %v4154_v40 = vadd.f32 %v2384_v24, %v2097_v53  ;;  %v4162_v23 = vadd.f32 %v2386_v38, %v2093_v60  ;;  %v3194_v24 = vmul.f32 -1.442695, %v4139_v8 }
 0xfdd   :  { %v2388_v50 = vpop.f32.mrb[27].mxu0  ;;  %v3465_v52 = vpop.eup %3464  ;;  %3484 = vrcp.f32 %v2576_v36  ;;  %v2591_v54 = vadd.f32 1.0, %v3463_v45  ;;  %v3181_v38 = vmul.f32 -1.442695, %v4146_v16 }
 0xfde   :  { %v3467_v57 = vpop.eup %3466  ;;  %3486 = vrcp.f32 %v2589_v46  ;;  %v2590_v59 = vadd.f32 1.0, %v3465_v52  ;;  %v4164_v52 = vadd.f32 %v2345_v44, %v2089_v51  ;;  %v4179_v44 = vrot.slane %v4119_v33, %v2076_v30 }
 0xfdf   :  { %v3469_v63 = vpop.eup %3468  ;;  %3488 = vrcp.f32 %v2591_v54  ;;  %v2592_v4 = vadd.f32 1.0, %v3467_v57  ;;  %v2425_v17 = vpop.f32.mrb[36].mxu1  ;;  %v3180_v51 = vmul.f32 -1.442695, %v4148_v22 }
 0xfe0   :  { %v3471_v5 = vpop.eup %3470  ;;  %3490 = vrcp.f32 %v2590_v59  ;;  %v2577_v15 = vadd.f32 1.0, %v3469_v63  ;;  %v2468_v12 = vpop.f32.mrb[28].mxu0  ;;  %v3179_v59 = vmul.f32 -1.442695, %v4142_v11  ;;  %v3182_v63 = vmul.f32 -1.442695, %v4154_v40 }
 0xfe1   :  { %v3473_v10 = vpop.eup %3472  ;;  %3492 = vrcp.f32 %v2592_v4  ;;  %v2579_v1 = vadd.f32 1.0, %v3471_v5  ;;  %v4144_v0 = vpop.f32.mrb[37].mxu1  ;;  %v4183_v4 = vadd.f32 %v2388_v50, %v2097_v53  ;;  %v3195_v5 = vmul.f32 -1.442695, %v4156_v20 }
 0xfe2   :  { %v3475_v13 = vpop.eup %3474  ;;  %3494 = vrcp.f32 %v2577_v15  ;;  %v2578_v18 = vadd.f32 1.0, %v3473_v10  ;;  %v4150_v39 = vpop.f32.mrb[29].mxu0  ;;  %v3197_v15 = vmul.f32 -1.442695, %v4162_v23  ;;  %v3196_v10 = vmul.f32 -1.442695, %v4164_v52 }
 0xfe3   :  { %v4152_v9 = vpop.f32.mrb[38].mxu1  ;;  %v3477_v27 = vpop.eup %3476  ;;  %3496 = vrcp.f32 %v2579_v1  ;;  %v2580_v28 = vadd.f32 1.0, %v3475_v13 }
 0xfe4   :  { %v4158_v36 = vpop.f32.mrb[30].mxu0  ;;  %v4160_v45 = vpop.f32.mrb[39].mxu1  ;;  %3498 = vrcp.f32 %v2578_v18  ;;  %v2593_v21 = vadd.f32 1.0, %v3477_v27 }
 0xfe5   :  { %v3479_v46 = vpop.eup %3478  ;;  %v4166_v54 = vpop.f32.mrb[31].mxu0  ;;  %3500 = vrcp.f32 %v2580_v28 }
 0xfe6   :  { %v3481_v57 = vpop.eup %3480  ;;  %3502 = vrcp.f32 %v2593_v21  ;;  %v2669_v30 = vmul.f32 %v3479_v46, %v4062_v25 }
 0xfe7   :  { %v3483_v56 = vpop.eup %3482  ;;  %3504 = vpow2.f32 %v3193_v6  ;;  %v4191_v6 = vadd.f32 %v2425_v17, %v4172_v34  ;;  %v2671_v50 = vmul.f32 %v3481_v57, %v4064_v26 }
 0xfe8   :  { %v3485_v60 = vpop.eup %3484  ;;  %3506 = vpow2.f32 %v3192_v19  ;;  %v4196_v19 = vadd.f32 %v2468_v12, %v4179_v44  ;;  %v2670_v28 = vmul.f32 %v3483_v56, %v4068_v31  ;;  %v2721_v56 = vld [vmem:[#allocation3 + $0x20] sm:$0xff] }
 0xfe9   :  { %v3487_v29 = vpop.eup %3486  ;;  %3508 = vpow2.f32 %v3194_v24  ;;  %v2672_v17 = vmul.f32 %v3485_v60, %v4070_v32  ;;  %v3183_v31 = vmul.f32 -1.442695, %v4191_v6 }
 0xfea   :  { %v3489_v1 = vpop.eup %3488  ;;  %v2685_v13 = vmul.f32 %v3487_v29, %v4076_v42  ;;  %3510 = vpow2.f32 %v3179_v59  ;;  %v3185_v32 = vmul.f32 -1.442695, %v4196_v19 }
 0xfeb   :  { %v3491_v18 = vpop.eup %3490  ;;  %v2687_v53 = vmul.f32 %v3489_v1, %v4078_v43  ;;  %3512 = vpow2.f32 %v3181_v38  ;;  %v3198_v43 = vmul.f32 -1.442695, %v4183_v4  ;;  %v2738_v38 = vld [vmem:[#allocation3 + $0xa8] sm:$0xff] }
 0xfec   :  { %v3493_v27 = vpop.eup %3492  ;;  %v2701_v21 = vpack.c.bf16 %v2685_v13, %v2669_v30  ;;  %v2686_v25 = vmul.f32 %v3491_v18, %v4082_v47  ;;  %3514 = vpow2.f32 %v3180_v51  ;;  %v2740_v51 = vld [vmem:[#allocation3 + $0xb8] sm:$0xff] }
 0xfed   :  { %v3495_v42 = vpop.eup %3494  ;;  %v2703_v46 = vpack.c.bf16 %v2687_v53, %v2671_v50  ;;  %v2688_v24 = vmul.f32 %v3493_v27, %v4084_v48  ;;  %3516 = vpow2.f32 %v3182_v63  ;;  %v2723_v48 = vld [vmem:[#allocation3 + $0x30] sm:$0xff]  ;;  %v2105_v53 = vrot.slane %v4119_v33, %v2072_v35 }
 0xfee   :  { %v4202_v26 = vpop.eup %3496  ;;  %v2702_v12 = vpack.c.bf16 %v2686_v25, %v2670_v28  ;;  %3518 = vpow2.f32 %v3195_v5  ;;  %v4212_v29 = vmul.f32 %v3495_v42, %v4100_v41  ;;  %v2737_v25 = vld [vmem:[#allocation3 + $0xa0] sm:$0xff] }
 0xfef   :  { %v4205_v57 = vpop.eup %3498  ;;  %v2704_v47 = vpack.c.bf16 %v2688_v24, %v2672_v17  ;;  %3520 = vpow2.f32 %v3197_v15  ;;  %v2726_v24 = vld [vmem:[#allocation3 + $0x48] sm:$0xff] }
 0xff0   :  { %v4208_v59 = vpop.eup %3500  ;;  %2788 = vmatprep.mubr.bf16.mxu1 %v2702_v12  ;;  %3522 = vpow2.f32 %v3196_v10 }
 0xff1   :  { %v3503_v60 = vpop.eup %3502  ;;  %2829 = vmatprep.mubr.bf16.mxu0 %v2704_v47  ;;  %2789 = vmatmul.mubr.bf16.vlgmr.msra.gmra.mrb[40].mxu1 %v2701_v21  ;;  %3524 = vpow2.f32 %v3198_v43  ;;  %v2113_v21 = vrot.slane %v4119_v33, %v2080_v37 }
 0xff2   :  { %v3505_v63 = vpop.eup %3504  ;;  %v4215_v5 = vmul.f32 %v3503_v60, %v4111_v7  ;;  %2830 = vmatmul.mubr.bf16.vlgmr.msra.gmra.mrb[32].mxu0 %v2703_v46  ;;  %2839 = vmatpush1.bf16.xpose.msra.mxu1 %v2721_v56  ;;  %3526 = vpow2.f32 %v3183_v31  ;;  %v2739_v46 = vld [vmem:[#allocation3 + $0xb0] sm:$0xff]  ;;  %v2728_v31 = vld [vmem:[#allocation3 + $0x58] sm:$0xff]  ;;  %v4226_v56 = vadd.f32 %v4144_v0, %v2105_v53 }
 0xff3   :  { %v3507_v15 = vpop.eup %3506  ;;  %v2595_v1 = vadd.f32 1.0, %v3505_v63  ;;  %2880 = vmatpush1.bf16.xpose.msra.mxu0 %v2723_v48  ;;  %2840 = vmatprep.subr.bf16.mxu1 %v2738_v38  ;;  %3528 = vpow2.f32 %v3185_v32  ;;  %v4229_v33 = vadd.f32 %v4150_v39, %v2113_v21  ;;  %v4233_v38 = vadd.f32 %v4152_v9, %v4172_v34 }
 0xff4   :  { %v3509_v30 = vpop.eup %3508  ;;  %v2705_v10 = vpack.c.bf16 %v4215_v5, %v4212_v29  ;;  %v2594_v13 = vadd.f32 1.0, %v3507_v15  ;;  %2881 = vmatprep.subr.bf16.mxu0 %v2740_v51  ;;  %v4237_v51 = vadd.f32 %v4158_v36, %v4179_v44  ;;  %v4240_v39 = vadd.f32 %v4160_v45, %v2105_v53 }
 0xff5   :  { %v3511_v41 = vpop.eup %3510  ;;  %3530 = vrcp.f32 %v2595_v1  ;;  %v2596_v18 = vadd.f32 1.0, %v3509_v30  ;;  %v3184_v15 = vmul.f32 -1.442695, %v4226_v56  ;;  %v3186_v9 = vmul.f32 -1.442695, %v4229_v33 }
 0xff6   :  { %v3513_v7 = vpop.eup %3512  ;;  %3532 = vrcp.f32 %v2594_v13  ;;  %v2581_v50 = vadd.f32 1.0, %v3511_v41  ;;  %v4245_v34 = vadd.f32 %v4166_v54, %v2113_v21  ;;  %v2675_v13 = vmul.f32 %v4202_v26, %v4102_v58 }
 0xff7   :  { %v3515_v27 = vpop.eup %3514  ;;  %3534 = vrcp.f32 %v2596_v18  ;;  %v2583_v28 = vadd.f32 1.0, %v3513_v7  ;;  %v3199_v45 = vmul.f32 -1.442695, %v4233_v38  ;;  %v2674_v41 = vmul.f32 %v4205_v57, %v4104_v61  ;;  %v2725_v57 = vld [vmem:[#allocation3 + $0x40] sm:$0xff] }
 0xff8   :  { %v3517_v42 = vpop.eup %3516  ;;  %3536 = vrcp.f32 %v2581_v50  ;;  %v2582_v17 = vadd.f32 1.0, %v3515_v27  ;;  %v3201_v7 = vmul.f32 -1.442695, %v4237_v51  ;;  %v3200_v50 = vmul.f32 -1.442695, %v4240_v39 }
 0xff9   :  { %v3519_v43 = vpop.eup %3518  ;;  %3538 = vrcp.f32 %v2583_v28  ;;  %v2584_v12 = vadd.f32 1.0, %v3517_v42  ;;  %v2676_v53 = vmul.f32 %v4208_v59, %v4107_v62  ;;  %v3202_v26 = vmul.f32 -1.442695, %v4245_v34  ;;  %v2742_v42 = vld [vmem:[#allocation3 + $0xc8] sm:$0xff]  ;;  %v2744_v62 = vld [vmem:[#allocation3 + $0xd8] sm:$0xff] }
 0xffa   :  { %v3521_v47 = vpop.eup %3520  ;;  %3540 = vrcp.f32 %v2582_v17  ;;  %v2597_v35 = vadd.f32 1.0, %v3519_v43  ;;  %2841 = vmatpush1.bf16.xpose.msra.mxu1 %v2737_v25  ;;  %v2727_v25 = vld [vmem:[#allocation3 + $0x50] sm:$0xff] }
 0xffb   :  { %v3523_v14 = vpop.eup %3522  ;;  %3542 = vrcp.f32 %v2584_v12  ;;  %v2599_v37 = vadd.f32 1.0, %v3521_v47  ;;  %2882 = vmatpush1.bf16.xpose.msra.mxu0 %v2739_v46  ;;  %2920 = vmatprep.subr.bf16.mxu1 %v2726_v24 }
 0xffc   :  { %v3525_v32 = vpop.eup %3524  ;;  %3544 = vrcp.f32 %v2597_v35  ;;  %v2598_v48 = vadd.f32 1.0, %v3523_v14  ;;  %2961 = vmatprep.subr.bf16.mxu0 %v2728_v31 }
 0xffd   :  { %v3527_v60 = vpop.eup %3526  ;;  %3546 = vrcp.f32 %v2599_v37  ;;  %v2600_v0 = vadd.f32 1.0, %v3525_v32 }
 0xffe   :  { %v3529_v63 = vpop.eup %3528  ;;  %3548 = vrcp.f32 %v2598_v48  ;;  %v2585_v47 = vadd.f32 1.0, %v3527_v60  ;;  %v2732_v60 = vld [vmem:[#allocation3 + $0x78] sm:$0xff] }
 0xfff   :  { %v3531_v1 = vpop.eup %3530  ;;  %3550 = vrcp.f32 %v2600_v0  ;;  %v2587_v14 = vadd.f32 1.0, %v3529_v63 }
0x1000   :  { %v3533_v30 = vpop.eup %3532  ;;  %v2691_v36 = vmul.f32 %v3531_v1, %v4121_v49  ;;  %3552 = vpow2.f32 %v3184_v15  ;;  %v2730_v15 = vld [vmem:[#allocation3 + $0x68] sm:$0xff] }
0x1001   :  { %v3535_v44 = vpop.eup %3534  ;;  %v2690_v18 = vmul.f32 %v3533_v30, %v4123_v55  ;;  %3554 = vpow2.f32 %v3186_v9 }
0x1002   :  { %v3537_v54 = vpop.eup %3536  ;;  %v2707_v27 = vpack.c.bf16 %v2691_v36, %v2675_v13  ;;  %v2692_v58 = vmul.f32 %v3535_v44, %v4139_v8  ;;  %3556 = vpow2.f32 %v3199_v45  ;;  %v2729_v45 = vld [vmem:[#allocation3 + $0x60] sm:$0xff]  ;;  %v2731_v44 = vld [vmem:[#allocation3 + $0x70] sm:$0xff] }
0x1003   :  { %v3539_v49 = vpop.eup %3538  ;;  %v2706_v28 = vpack.c.bf16 %v2690_v18, %v2674_v41  ;;  %3558 = vpow2.f32 %v3201_v7  ;;  %v2677_v59 = vmul.f32 %v3537_v54, %v4142_v11  ;;  %v2746_v41 = vld [vmem:[#allocation3 + $0xe8] sm:$0xff]  ;;  %v2748_v18 = vld [vmem:[#allocation3 + $0xf8] sm:$0xff] }
0x1004   :  { %v3541_v61 = vpop.eup %3540  ;;  %v2708_v55 = vpack.c.bf16 %v2692_v58, %v2676_v53  ;;  %3560 = vpow2.f32 %v3200_v50  ;;  %v2679_v43 = vmul.f32 %v3539_v49, %v4146_v16 }
0x1005   :  { %v3543_v21 = vpop.eup %3542  ;;  %2870 = vmatprep.mubr.bf16.mxu1 %v2706_v28  ;;  %3562 = vpow2.f32 %v3202_v26  ;;  %v2678_v29 = vmul.f32 %v3541_v61, %v4148_v22  ;;  %v2743_v22 = vld [vmem:[#allocation3 + $0xd0] sm:$0xff]  ;;  %v2745_v28 = vld [vmem:[#allocation3 + $0xe0] sm:$0xff] }
0x1006   :  { %v3545_v17 = vpop.eup %3544  ;;  %2911 = vmatprep.mubr.bf16.mxu0 %v2708_v55  ;;  %2871 = vmatmul.mubr.bf16.vlgmr.msra.gmra.mrb[44].mxu1 %v2705_v10  ;;  %v2680_v11 = vmul.f32 %v3543_v21, %v4154_v40  ;;  %3564 = vrcp.f32 %v2585_v47  ;;  %v2747_v21 = vld [vmem:[#allocation3 + $0xf0] sm:$0xff] }
0x1007   :  { %v3547_v8 = vpop.eup %3546  ;;  %v2693_v46 = vmul.f32 %v3545_v17, %v4156_v20  ;;  %2912 = vmatmul.mubr.bf16.vlgmr.msra.gmra.mrb[36].mxu0 %v2707_v27  ;;  %2921 = vmatpush1.bf16.xpose.msra.mxu1 %v2725_v57  ;;  %3566 = vrcp.f32 %v2587_v14 }
0x1008   :  { %v3549_v24 = vpop.eup %3548  ;;  %v2695_v12 = vmul.f32 %v3547_v8, %v4162_v23  ;;  %2962 = vmatpush1.bf16.xpose.msra.mxu0 %v2727_v25  ;;  %2922 = vmatprep.subr.bf16.mxu1 %v2742_v42  ;;  %v2741_v23 = vld [vmem:[#allocation3 + $0xc0] sm:$0xff] }
0x1009   :  { %v3551_v31 = vpop.eup %3550  ;;  %v2709_v5 = vpack.c.bf16 %v2693_v46, %v2677_v59  ;;  %v2694_v10 = vmul.f32 %v3549_v24, %v4164_v52  ;;  %2963 = vmatprep.subr.bf16.mxu0 %v2744_v62 }
0x100a   :  { %v2711_v20 = vpack.c.bf16 %v2695_v12, %v2679_v43  ;;  %v2696_v35 = vmul.f32 %v3551_v31, %v4183_v4  ;;  %v3553_v16 = vpop.eup %3552 }
0x100b   :  { %v2710_v37 = vpack.c.bf16 %v2694_v10, %v2678_v29  ;;  %v3555_v48 = vpop.eup %3554  ;;  %v2586_v0 = vadd.f32 1.0, %v3553_v16 }
0x100c   :  { %v2712_v32 = vpack.c.bf16 %v2696_v35, %v2680_v11  ;;  %v3557_v1 = vpop.eup %3556  ;;  %v2588_v52 = vadd.f32 1.0, %v3555_v48 }
0x100d   :  { %2952 = vmatprep.mubr.bf16.mxu1 %v2710_v37  ;;  %v3559_v40 = vpop.eup %3558  ;;  %3568 = vrcp.f32 %v2586_v0  ;;  %v2601_v9 = vadd.f32 1.0, %v3557_v1 }
0x100e   :  { %2993 = vmatprep.mubr.bf16.mxu0 %v2712_v32  ;;  %v3561_v4 = vpop.eup %3560  ;;  %3570 = vrcp.f32 %v2588_v52  ;;  %v2603_v63 = vadd.f32 1.0, %v3559_v40 }
0x100f   :  { %2923 = vmatpush1.bf16.xpose.msra.mxu1 %v2741_v23  ;;  %v3563_v30 = vpop.eup %3562  ;;  %3572 = vrcp.f32 %v2601_v9  ;;  %v2602_v13 = vadd.f32 1.0, %v3561_v4 }
0x1010   :  { %2964 = vmatpush1.bf16.xpose.msra.mxu0 %v2743_v22  ;;  %3002 = vmatprep.subr.bf16.mxu1 %v2730_v15  ;;  %3574 = vrcp.f32 %v2603_v63  ;;  %v2604_v36 = vadd.f32 1.0, %v3563_v30  ;;  %v3565_v7 = vpop.eup %3564 }
0x1011   :  { %3043 = vmatprep.subr.bf16.mxu0 %v2732_v60  ;;  %3576 = vrcp.f32 %v2602_v13  ;;  %v3567_v50 = vpop.eup %3566  ;;  %v2681_v49 = vmul.f32 %v3565_v7, %v4191_v6 }
0x1012   :  { %3578 = vrcp.f32 %v2604_v36  ;;  %v2683_v55 = vmul.f32 %v3567_v50, %v4196_v19  ;;  %v3203_v19 = vld [vmem:[%s4313_s12] ss:$0 sm:$0xff]  ;;  %s3708_s12 = smov [#allocation11]  }
0x1013   :  { %s3093_s11 = sshll.u32 %s3708_s12, 4  ;;  %s3094_s11 = int_to_ptr.vmem [resolvable:$true] %s3093_s11 }
0x1014   :  { %s3646_s3 = scalar_lea.vmem %s3094_s11, 256  ;;  %p3651_p11 = scmp.lt.s32.totalorder %s3094_s11, %s3094_s11 }
0x1015   :  { %p3647_p10 = scmp.ne.s32.totalorder %s3094_s11, %s3646_s3  ;;  %p3652_p12 = scmp.lt.s32.totalorder %s3646_s3, %s3646_s3 }
0x1016   :  { %2953 = vmatmul.mubr.bf16.vlgmr.msra.gmra.mrb[48].mxu1 %v2709_v5 }
0x1017   :  { %2994 = vmatmul.mubr.bf16.vlgmr.msra.gmra.mrb[40].mxu0 %v2711_v20  ;;  %3003 = vmatpush1.bf16.xpose.msra.mxu1 %v2729_v45  ;;  %v3569_v54 = vpop.eup %3568  ;;  %p3653_p13 = por %p3652_p12, %p3651_p11 }
0x1018   :  { %3044 = vmatpush1.bf16.xpose.msra.mxu0 %v2731_v44  ;;  %3004 = vmatprep.subr.bf16.mxu1 %v2746_v41  ;;  %v3571_v53 = vpop.eup %3570  ;;  %v2682_v42 = vmul.f32 %v3569_v54, %v4226_v56 }
0x1019   :  { %3045 = vmatprep.subr.bf16.mxu0 %v2748_v18  ;;  %v3573_v27 = vpop.eup %3572  ;;  %v2684_v8 = vmul.f32 %v3571_v53, %v4229_v33  ;;  %p3654_p0 = pnand %p3653_p13, %p3647_p10 }
0x101a   :  { %v3575_v58 = vpop.eup %3574  ;;  %v2697_v26 = vmul.f32 %v3573_v27, %v4233_v38 }
0x101b   :  { %v3577_v61 = vpop.eup %3576  ;;  %v2699_v57 = vmul.f32 %v3575_v58, %v4237_v51 }
0x101c   :  { %v3579_v25 = vpop.eup %3578  ;;  %v2713_v17 = vpack.c.bf16 %v2697_v26, %v2681_v49  ;;  %v2698_v62 = vmul.f32 %v3577_v61, %v4240_v39 }
0x101d   :  { %v2715_v59 = vpack.c.bf16 %v2699_v57, %v2683_v55  ;;  %v2700_v6 = vmul.f32 %v3579_v25, %v4245_v34 }
0x101e   :  { %v2714_v38 = vpack.c.bf16 %v2698_v62, %v2682_v42 }
0x101f   :  { %3005 = vmatpush1.bf16.xpose.msra.mxu1 %v2745_v28  ;;  %v2716_v46 = vpack.c.bf16 %v2700_v6, %v2684_v8 }
0x1020   :  { %3046 = vmatpush1.bf16.xpose.msra.mxu0 %v2747_v21  ;;  %3034 = vmatprep.mubr.bf16.mxu1 %v2714_v38 }
0x1021   :  { %3075 = vmatprep.mubr.bf16.mxu0 %v2716_v46 }
0x1026   :  { %3035 = vmatmul.mubr.bf16.vlgmr.msra.gmra.mrb[52].mxu1 %v2713_v17 }
0x1027   :  { %3076 = vmatmul.mubr.bf16.vlgmr.msra.gmra.mrb[44].mxu0 %v2715_v59 }
0x10c4   :  { %v2790_v56 = vpop.f32.mrb[40].mxu1 }
0x10c5   :  { %v2791_v51 = vadd.f32 %v3203_v19, %v2790_v56  ;;  %v2831_v39 = vpop.f32.mrb[32].mxu0  ;;  %v2792_v24 = vpop.f32.mrb[41].mxu1 }
0x10c6   :  { %v2833_v33 = vpop.f32.mrb[33].mxu0  ;;  %v2793_v43 = vpop.f32.mrb[42].mxu1 }
0x10c7   :  { %v2832_v12 = vadd.f32 %v2831_v39, %v2791_v51  ;;  %v2794_v34 = vadd.f32 %v3203_v19, %v2793_v43  ;;  %v2834_v31 = vpop.f32.mrb[34].mxu0  ;;  %v2795_v29 = vpop.f32.mrb[43].mxu1 }
0x10c8   :  { %v2836_v5 = vpop.f32.mrb[35].mxu0 }
0x10c9   :  { %v2835_v10 = vadd.f32 %v2834_v31, %v2794_v34 }
0x10d9   :  { %v2872_v47 = vpop.f32.mrb[44].mxu1 }
0x10da   :  { %v2873_v11 = vadd.f32 %v2872_v47, %v2832_v12  ;;  %v2913_v20 = vpop.f32.mrb[36].mxu0  ;;  %v2874_v35 = vpop.f32.mrb[45].mxu1 }
0x10db   :  { %v2915_v14 = vpop.f32.mrb[37].mxu0  ;;  %v2875_v37 = vpop.f32.mrb[46].mxu1 }
0x10dc   :  { %v2914_v16 = vadd.f32 %v2913_v20, %v2873_v11  ;;  %v2876_v32 = vadd.f32 %v2875_v37, %v2835_v10  ;;  %v2916_v23 = vpop.f32.mrb[38].mxu0  ;;  %v2877_v48 = vpop.f32.mrb[47].mxu1 }
0x10dd   :  { %v2918_v0 = vpop.f32.mrb[39].mxu0 }
0x10de   :  { %v2917_v22 = vadd.f32 %v2916_v23, %v2876_v32 }
0x10e9   :  { %v2954_v15 = vpop.f32.mrb[48].mxu1 }
0x10ea   :  { %v2955_v1 = vadd.f32 %v2954_v15, %v2914_v16  ;;  %v2995_v52 = vpop.f32.mrb[40].mxu0  ;;  %v2956_v60 = vpop.f32.mrb[49].mxu1 }
0x10eb   :  { %v2997_v40 = vpop.f32.mrb[41].mxu0  ;;  %v2957_v9 = vpop.f32.mrb[50].mxu1 }
0x10ec   :  { %v2996_v4 = vadd.f32 %v2995_v52, %v2955_v1  ;;  %v2958_v63 = vadd.f32 %v2957_v9, %v2917_v22  ;;  %v2998_v30 = vpop.f32.mrb[42].mxu0  ;;  %v2959_v13 = vpop.f32.mrb[51].mxu1 }
0x10ed   :  { %v3000_v36 = vpop.f32.mrb[43].mxu0 }
0x10ee   :  { %v2999_v45 = vadd.f32 %v2998_v30, %v2958_v63 }
0x10f9   :  { %v3036_v44 = vpop.f32.mrb[52].mxu1 }
0x10fa   :  { %v3037_v41 = vadd.f32 %v3036_v44, %v2996_v4  ;;  %v3077_v18 = vpop.f32.mrb[44].mxu0  ;;  %v3038_v7 = vpop.f32.mrb[53].mxu1 }
0x10fb   :  { %v3079_v50 = vpop.f32.mrb[45].mxu0  ;;  %v3039_v54 = vpop.f32.mrb[54].mxu1 }
0x10fc   :  { %v3078_v53 = vadd.f32 %v3077_v18, %v3037_v41  ;;  %v3040_v27 = vadd.f32 %v3039_v54, %v2999_v45  ;;  %v3080_v58 = vpop.f32.mrb[46].mxu0  ;;  %v3041_v49 = vpop.f32.mrb[55].mxu1 }
0x10fd   :  { %v3082_v26 = vpop.f32.mrb[47].mxu0 }
0x10fe   :  { %v3084_v28 = vadd.f32 %v3078_v53, %v4013_v3  ;;  %v3081_v61 = vadd.f32 %v3080_v58, %v3040_v27 }
0x1100   :  { %3086 = vst.msk [vmem:[#allocation11] sm:$0xff] %vm157_vm0, %v3084_v28  ;;  %v3085_v55 = vadd.f32 %v3081_v61, %v4010_v2 }
0x1102   :  { %3087 = vst.msk [vmem:[#allocation11 + $0x8] sm:$0xff] %vm157_vm0, %v3085_v55 }
0x1103   :  { %3657 = shalt.err (!%p3654_p0)
}
0x1104   :  { %s3658_s2 = scalar_lea.hbm %s4314_s13, 256 }
0x1105   :  { %p3659_p1 = scmp.ne.s32.totalorder %s4314_s13, %s3658_s2  ;;  %p3662_p2 = scmp.lt.u32.totalorder %s3658_s2, %s4314_s13 }
0x1107   :  { %p3664_p3 = pnand %p3662_p2, %p3659_p1 }
0x1109   :  { %3667 = shalt.err (!%p3664_p3)
}
0x110a   :  { %3099 = dma.vmem_to_hbm [thread:$0]  %s3094_s11, 256, %s4314_s13, [#allocation7], %s3680_s20, %s3680_s20, %s3681_s21  }
0x110b   :  { %3676 = dma.done.wait [#allocation7], 256  }
0x110c   :  { %3677 = vsyncadd [#allocation7], 4294967040 }
0x110d   :  { %3103 = vsyncpa [#allocation6], 1 }
0x110e   :  { %3104 = vsyncpa [#allocation9], 1 }
0x110f   :  { %3105 = vsyncpa [#allocation7], 1 }
0x1110   :  { %3106 = vsyncmov [#allocation4] }
0x1113   :  { %s3107_s23 = vpop.sfrf %3106 }
0x1114   :  { %p3204_p4 = scmp.ne.s32.totalorder %s3107_s23, 0 }
0x1116   :  { %3111 = shalt.err (%p3204_p4)  }
0x1117   :  { %3113 = vsyncmov [#allocation4 + $0x1] }
0x111a   :  { %s3114_s24 = vpop.sfrf %3113 }
0x111b   :  { %p3205_p5 = scmp.ne.s32.totalorder %s3114_s24, 0 }
0x111d   :  { %3118 = shalt.err (%p3205_p5)  }

</bundles_post_ra>
